<compile_context>
chip_gen: v7x
topology: tpu7x:2x2x1
jax: 0.10.0
libtpu: 0.0.40
codegen_flags: <defaults>
</compile_context>

<pallas_src>
import jax
import jax.numpy as jnp
from jax.experimental import pallas as pl
from jax.experimental.pallas import tpu as pltpu


def _round_up(x, m):
    return (x + m - 1) // m * m


def decoder_kernel(z_ref, w1_ref, b1_ref, w2_ref, b2_ref, o_ref):
    # z: [TB, L] f32, w1: [L, 512] f32, b1: [1, 512] f32,
    # w2: [512, TN] bf16, b2: [1, TN] f32, o: [TB, TN] f32
    h = jnp.dot(z_ref[...], w1_ref[...], preferred_element_type=jnp.float32)
    h = jnp.maximum(h + b1_ref[...], 0.0)                      # ReLU (f32)
    y = jnp.dot(h.astype(jnp.bfloat16), w2_ref[...],
                preferred_element_type=jnp.float32)
    o_ref[...] = jax.nn.sigmoid(y + b2_ref[...])               # sigmoid (f32)


def prepare_decoder_params(w1, b1, w2, b2, *, col_tiles=1):
    """One-time weight prep: cast W2 to bf16 and pad to a lane-dense width.

    Do this ONCE per set of weights; the per-call forward must not repeat it.
    col_tiles=1 (pad 1600 -> 1664) is right for single-TC v5e/v6e; col_tiles=2
    only if the parallel column axis verifiably shards across v7x's two TCs.
    """
    H2 = w2.shape[1]
    Hp = _round_up(H2, 128 * col_tiles)
    w2b = w2.astype(jnp.bfloat16)
    b2f = b2.astype(jnp.float32).reshape(1, -1)
    if Hp != H2:
        w2b = jnp.pad(w2b, ((0, 0), (0, Hp - H2)))
        b2f = jnp.pad(b2f, ((0, 0), (0, Hp - H2)))
    params = {
        "w1": w1.astype(jnp.float32),                 # layer 1 stays f32
        "b1": b1.astype(jnp.float32).reshape(1, -1),
        "w2": w2b,                                    # bf16, padded
        "b2": b2f,                                    # f32, padded
    }
    params = jax.tree_util.tree_map(jax.block_until_ready, params)
    meta = {"H2": H2, "Hp": Hp, "col_tiles": col_tiles}
    return params, meta


def decoder_forward(z, params, meta, *, max_row_tile=512):
    """z: [B, L] float32 -> returns [B, 1, 40, 40] float32 (NCHW)."""
    B, L = z.shape
    w1, b1, w2, b2 = params["w1"], params["b1"], params["w2"], params["b2"]
    H1 = w1.shape[1]                       # 512
    H2 = meta["H2"]                        # 1600 (true output width)
    Hp = meta["Hp"]                        # padded, lane-dense
    col_tiles = meta["col_tiles"]
    TN = Hp // col_tiles

    # Tight, sublane-aligned row tiling: bounded padding for awkward B.
    n_row_target = max(1, -(-B // max_row_tile))       # cdiv(B, max_row_tile)
    TB = _round_up(-(-B // n_row_target), 8)            # cdiv(B, n_row), to 8
    n_row = -(-B // TB)
    Bp = n_row * TB
    zp = jnp.pad(z, ((0, Bp - B), (0, 0))) if Bp != B else z

    cost = pl.CostEstimate(
        flops=2 * Bp * (L * H1 + H1 * Hp),
        transcendentals=Bp * Hp,
        bytes_accessed=(zp.size * 4 + w1.size * 4 + b1.size * 4
                        + w2.size * 2 + b2.size * 4 + Bp * Hp * 4),
    )

    out2d = pl.pallas_call(
        decoder_kernel,
        out_shape=jax.ShapeDtypeStruct((Bp, Hp), jnp.float32),
        # Column axis outermost: each W2 tile is DMA'd once and reused across
        # all row tiles.  Both axes independent -> "parallel" for megacore.
        grid=(col_tiles, n_row),
        in_specs=[
            pl.BlockSpec((TB, L),  lambda j, i: (i, 0)),   # z rows
            pl.BlockSpec((L, H1),  lambda j, i: (0, 0)),   # W1 resident (f32)
            pl.BlockSpec((1, H1),  lambda j, i: (0, 0)),   # b1 resident
            pl.BlockSpec((H1, TN), lambda j, i: (0, j)),   # W2 column tile
            pl.BlockSpec((1, TN),  lambda j, i: (0, j)),   # b2 column tile
        ],
        out_specs=pl.BlockSpec((TB, TN), lambda j, i: (i, j)),
        compiler_params=pltpu.CompilerParams(
            dimension_semantics=("parallel", "parallel"),
            vmem_limit_bytes=32 * 1024 * 1024,
        ),
        cost_estimate=cost,
    )(zp, w1, b1, w2, b2)

    # Slice off row/column padding, then PyTorch's reshape((-1, 1, 40, 40)).
    return out2d[:B, :H2].reshape(-1, 1, 40, 40)


def init_params(key, latent_dims):
    """Deterministic init mimicking nn.Linear defaults (U(-1/sqrt(fan_in), ...))."""
    k1, k2, k3, k4 = jax.random.split(key, 4)
    bound1 = 1.0 / jnp.sqrt(latent_dims)
    bound2 = 1.0 / jnp.sqrt(512.0)
    # Weights stored as [in, out] (transposed w.r.t. PyTorch's [out, in]).
    w1 = jax.random.uniform(k1, (latent_dims, 512), jnp.float32, -bound1, bound1)
    b1 = jax.random.uniform(k2, (1, 512), jnp.float32, -bound1, bound1)
    w2 = jax.random.uniform(k3, (512, 1600), jnp.float32, -bound2, bound2)
    b2 = jax.random.uniform(k4, (1, 1600), jnp.float32, -bound2, bound2)
    return w1, b1, w2, b2


if __name__ == "__main__":
    latent_dims = 32
    batch = 8

    key = jax.random.PRNGKey(0)
    kz, kp = jax.random.split(key)
    z = jax.random.normal(kz, (batch, latent_dims), dtype=jnp.float32)
    w1, b1, w2, b2 = init_params(kp, latent_dims)

    # One-time weight prep (cast + pad hoisted out of the forward pass).
    params, meta = prepare_decoder_params(w1, b1, w2, b2, col_tiles=1)

    out = decoder_forward(z, params, meta)
    out = jax.block_until_ready(out)
    assert out.shape == (batch, 1, 40, 40), out.shape

    # Reference with the same casts as the kernel: layer 1 in f32, then
    # h -> bf16, W2 -> bf16, f32 accumulate.
    h_ref = jnp.maximum(z @ w1 + b1, 0.0)
    ref_bf16 = jax.nn.sigmoid(
        jnp.dot(h_ref.astype(jnp.bfloat16), w2.astype(jnp.bfloat16),
                preferred_element_type=jnp.float32) + b2
    ).reshape(-1, 1, 40, 40)
    assert jnp.allclose(out, ref_bf16, atol=5e-3, rtol=0), (
        float(jnp.max(jnp.abs(out - ref_bf16))))

    # Loose check against the pure-f32 reference (bf16 W2 costs ~1e-2 abs).
    ref_f32 = jax.nn.sigmoid(
        jnp.maximum(z @ w1 + b1, 0.0) @ w2 + b2).reshape(-1, 1, 40, 40)
    assert jnp.allclose(out, ref_f32, atol=3e-2, rtol=0), (
        float(jnp.max(jnp.abs(out - ref_f32))))

    print("KERNEL_OK")
</pallas_src>

<mosaic_0001>
module attributes {stable_mosaic.version = 11 : i64} {
  func.func @decoder_kernel(%arg0: i32, %arg1: i32, %arg2: memref<8x32xf32, #tpu.memory_space<vmem>>, %arg3: memref<32x512xf32, #tpu.memory_space<vmem>>, %arg4: memref<1x512xf32, #tpu.memory_space<vmem>>, %arg5: memref<512x1664xbf16, #tpu.memory_space<vmem>>, %arg6: memref<1x1664xf32, #tpu.memory_space<vmem>>, %arg7: memref<8x1664xf32, #tpu.memory_space<vmem>>) attributes {dimension_semantics = [#tpu.dimension_semantics<parallel>, #tpu.dimension_semantics<parallel>], iteration_bounds = array<i64: 1, 1>, scalar_prefetch = 0 : i64, scratch_operands = 0 : i64, tpu.core_type = #tpu.core_type<tc>, window_params = [{transform_indices = @transform_0, window_bounds = array<i64: 8, 32>}, {pipeline_mode = #tpu.pipeline_mode<synchronous>, transform_indices = @transform_1, window_bounds = array<i64: 32, 512>}, {pipeline_mode = #tpu.pipeline_mode<synchronous>, transform_indices = @transform_2, window_bounds = array<i64: 1, 512>}, {transform_indices = @transform_3, window_bounds = array<i64: 512, 1664>}, {transform_indices = @transform_4, window_bounds = array<i64: 1, 1664>}, {transform_indices = @transform_5, window_bounds = array<i64: 8, 1664>}]} {
    %c0 = arith.constant 0 : index
    %c0_0 = arith.constant 0 : index
    %0 = vector.load %arg2[%c0, %c0_0] : memref<8x32xf32, #tpu.memory_space<vmem>>, vector<8x32xf32>
    %c0_1 = arith.constant 0 : index
    %c0_2 = arith.constant 0 : index
    %1 = vector.load %arg3[%c0_1, %c0_2] : memref<32x512xf32, #tpu.memory_space<vmem>>, vector<32x512xf32>
    %cst = arith.constant dense<0.000000e+00> : vector<8x512xf32>
    %2 = tpu.matmul %0, %1, %cst {dimension_numbers = #tpu.dot_dimension_numbers<[1], [0], [0], [1], [0, 0, 1, 1], [], []>} : vector<8x32xf32>, vector<32x512xf32>, vector<8x512xf32> -> vector<8x512xf32>
    %c0_3 = arith.constant 0 : index
    %c0_4 = arith.constant 0 : index
    %3 = vector.load %arg4[%c0_3, %c0_4] : memref<1x512xf32, #tpu.memory_space<vmem>>, vector<1x512xf32>
    %4 = vector.broadcast %3 : vector<1x512xf32> to vector<8x512xf32>
    %5 = arith.addf %2, %4 : vector<8x512xf32>
    %cst_5 = arith.constant 0.000000e+00 : f32
    %6 = vector.broadcast %cst_5 : f32 to vector<8x512xf32>
    %7 = arith.maximumf %5, %6 : vector<8x512xf32>
    %8 = arith.truncf %7 : vector<8x512xf32> to vector<8x512xbf16>
    %c0_6 = arith.constant 0 : index
    %c0_7 = arith.constant 0 : index
    %9 = vector.load %arg5[%c0_6, %c0_7] : memref<512x1664xbf16, #tpu.memory_space<vmem>>, vector<512x1664xbf16>
    %cst_8 = arith.constant dense<0.000000e+00> : vector<8x1664xf32>
    %10 = tpu.matmul %8, %9, %cst_8 {dimension_numbers = #tpu.dot_dimension_numbers<[1], [0], [0], [1], [0, 0, 1, 1], [], []>} : vector<8x512xbf16>, vector<512x1664xbf16>, vector<8x1664xf32> -> vector<8x1664xf32>
    %c0_9 = arith.constant 0 : index
    %c0_10 = arith.constant 0 : index
    %11 = vector.load %arg6[%c0_9, %c0_10] : memref<1x1664xf32, #tpu.memory_space<vmem>>, vector<1x1664xf32>
    %12 = vector.broadcast %11 : vector<1x1664xf32> to vector<8x1664xf32>
    %13 = arith.addf %10, %12 : vector<8x1664xf32>
    %14 = arith.negf %13 : vector<8x1664xf32>
    %15 = math.exp %14 : vector<8x1664xf32>
    %cst_11 = arith.constant 1.000000e+00 : f32
    %16 = vector.broadcast %cst_11 : f32 to vector<8x1664xf32>
    %17 = arith.addf %16, %15 : vector<8x1664xf32>
    %18 = arith.divf %16, %17 : vector<8x1664xf32>
    %c0_12 = arith.constant 0 : index
    %c0_13 = arith.constant 0 : index
    %19 = vector.load %arg7[%c0_12, %c0_13] : memref<8x1664xf32, #tpu.memory_space<vmem>>, vector<8x1664xf32>
    tpu.vector_store %arg7[%c0_12, %c0_13], %18 {strides = array<i32>} : memref<8x1664xf32, #tpu.memory_space<vmem>>, vector<8x1664xf32>,
    return
  }
  func.func @transform_0(%arg0: i32, %arg1: i32) -> (i32, i32) {
    %c0_i32 = arith.constant 0 : i32
    %c0_i32_0 = arith.constant 0 : i32
    return %arg1, %c0_i32 : i32, i32
  }
  func.func @transform_1(%arg0: i32, %arg1: i32) -> (i32, i32) {
    %c0_i32 = arith.constant 0 : i32
    %c0_i32_0 = arith.constant 0 : i32
    %c0_i32_1 = arith.constant 0 : i32
    return %c0_i32, %c0_i32_0 : i32, i32
  }
  func.func @transform_2(%arg0: i32, %arg1: i32) -> (i32, i32) {
    %c0_i32 = arith.constant 0 : i32
    %c0_i32_0 = arith.constant 0 : i32
    %c0_i32_1 = arith.constant 0 : i32
    return %c0_i32, %c0_i32_0 : i32, i32
  }
  func.func @transform_3(%arg0: i32, %arg1: i32) -> (i32, i32) {
    %c0_i32 = arith.constant 0 : i32
    %c0_i32_0 = arith.constant 0 : i32
    return %c0_i32, %arg0 : i32, i32
  }
  func.func @transform_4(%arg0: i32, %arg1: i32) -> (i32, i32) {
    %c0_i32 = arith.constant 0 : i32
    %c0_i32_0 = arith.constant 0 : i32
    return %c0_i32, %arg0 : i32, i32
  }
  func.func @transform_5(%arg0: i32, %arg1: i32) -> (i32, i32) {
    %c0_i32 = arith.constant 0 : i32
    return %arg1, %arg0 : i32, i32
  }
}

</mosaic_0001>

<bundles_post_ra>
// kernel: tpu_custom_call.1
= control target key start
LH: loop header
LB: loop body
LE: loop exit
PB: predicated region body
PF: predicated region fallthrough
CT: control target
= control target key end

     0   :  { %10 = vsyncpa [#allocation3], 0  ;;  %s5126_s0 = inlined_call_operand.hbm [shape: f32[8,32], index: 0, kind: input, shape index: {}]   ;;  %s5127_s1 = inlined_call_operand.hbm [shape: f32[32,512], index: 1, kind: input, shape index: {}]   ;;  %s5128_s2 = inlined_call_operand.hbm [shape: f32[1,512], index: 2, kind: input, shape index: {}]   ;;  %s5129_s3 = inlined_call_operand.hbm [shape: bf16[512,1664], index: 3, kind: input, shape index: {}]   ;;  %s5130_s4 = inlined_call_operand.hbm [shape: f32[1,1664], index: 4, kind: input, shape index: {}]   ;;  %s5131_s5 = inlined_call_operand.hbm [shape: f32[8,1664], index: 5, kind: output, shape index: {}]  }
   0x1   :  { %11 = vsyncpa [#allocation6], 0 }
   0x2   :  { %12 = vsyncpa [#allocation9], 0 }
   0x3   :  { %13 = vsyncpa [#allocation4], 0  ;;  %s4924_s18 = smov [#allocation5]   ;;  %s4784_s22 = scalar_lea.hbm %s5127_s1, 2048 }
   0x4   :  { %s29_s19 = sshll.u32 %s4924_s18, 4  ;;  %p4785_p0 = scmp.ne.s32.totalorder %s5127_s1, %s4784_s22  ;;  %s30_s19 = int_to_ptr.vmem [resolvable:$true] %s29_s19 }
   0x5   :  { %p4788_p1 = scmp.lt.u32.totalorder %s4784_s22, %s5127_s1 }
   0x7   :  { %p4790_p2 = pnand %p4788_p1, %p4785_p0 }
   0x9   :  { %4793 = shalt.err (!%p4790_p2)
}
   0xa   :  { %s4794_s27 = scalar_lea.vmem %s30_s19, 2048  ;;  %p4799_p4 = scmp.lt.s32.totalorder %s30_s19, %s30_s19 }
   0xb   :  { %p4795_p3 = scmp.ne.s32.totalorder %s30_s19, %s4794_s27  ;;  %p4800_p5 = scmp.lt.s32.totalorder %s4794_s27, %s4794_s27 }
   0xd   :  { %p4801_p6 = por %p4800_p5, %p4799_p4 }
   0xf   :  { %p4802_p7 = pnand %p4801_p6, %p4795_p3 }
  0x11   :  { %4805 = shalt.err (!%p4802_p7)
}
  0x12   :  { %s4925_s28 = smov 512   ;;  %s4926_s29 = smov 32  }
  0x13   :  { %35 = dma.hbm_to_vmem [thread:$0]  %s5127_s1, 2048, %s30_s19, [#allocation6], %s4925_s28, %s4925_s28, %s4926_s29  }
  0x14   :  { %s4927_s7 = smov [#allocation8]   ;;  %s4806_s11 = scalar_lea.hbm %s5129_s3, 53248 }
  0x15   :  { %s51_s8 = sshll.u32 %s4927_s7, 4  ;;  %p4807_p8 = scmp.ne.s32.totalorder %s5129_s3, %s4806_s11  ;;  %s52_s8 = int_to_ptr.vmem [resolvable:$true] %s51_s8 }
  0x16   :  { %p4810_p9 = scmp.lt.u32.totalorder %s4806_s11, %s5129_s3 }
  0x18   :  { %p4812_p10 = pnand %p4810_p9, %p4807_p8 }
  0x1a   :  { %4815 = shalt.err (!%p4812_p10)
}
  0x1b   :  { %s4816_s16 = scalar_lea.vmem %s52_s8, 53248  ;;  %p4821_p12 = scmp.lt.s32.totalorder %s52_s8, %s52_s8 }
  0x1c   :  { %p4817_p11 = scmp.ne.s32.totalorder %s52_s8, %s4816_s16  ;;  %p4822_p13 = scmp.lt.s32.totalorder %s4816_s16, %s4816_s16 }
  0x1e   :  { %p4823_p0 = por %p4822_p13, %p4821_p12 }
  0x20   :  { %p4824_p1 = pnand %p4823_p0, %p4817_p11 }
  0x22   :  { %4827 = shalt.err (!%p4824_p1)
}
  0x23   :  { %s4928_s1 = smov 832   ;;  %s4929_s17 = smov 52  }
  0x24   :  { %57 = dma.hbm_to_vmem [thread:$0]  %s5129_s3, 53248, %s52_s8, [#allocation9], %s4928_s1, %s4928_s1, %s4929_s17  }
  0x25   :  { %s4930_s20 = smov [#allocation2]   ;;  %s4931_s22 = smov [#allocation7]  }
  0x26   :  { %s20_s21 = sshll.u32 %s4930_s20, 4  ;;  %s42_s23 = sshll.u32 %s4931_s22, 4  ;;  %s21_s21 = int_to_ptr.vmem [resolvable:$true] %s20_s21  ;;  %s43_s23 = int_to_ptr.vmem [resolvable:$true] %s42_s23 }
  0x27   :  { %s4828_s26 = scalar_lea.hbm %s5126_s0, 128 }
  0x28   :  { %p4829_p2 = scmp.ne.s32.totalorder %s5126_s0, %s4828_s26  ;;  %p4832_p3 = scmp.lt.u32.totalorder %s4828_s26, %s5126_s0 }
  0x2a   :  { %p4834_p4 = pnand %p4832_p3, %p4829_p2 }
  0x2c   :  { %4837 = shalt.err (!%p4834_p4)
}
  0x2d   :  { %s4838_s3 = scalar_lea.vmem %s21_s21, 128  ;;  %p4843_p6 = scmp.lt.s32.totalorder %s21_s21, %s21_s21 }
  0x2e   :  { %p4839_p5 = scmp.ne.s32.totalorder %s21_s21, %s4838_s3  ;;  %p4844_p7 = scmp.lt.s32.totalorder %s4838_s3, %s4838_s3 }
  0x30   :  { %p4845_p8 = por %p4844_p7, %p4843_p6 }
  0x32   :  { %p4846_p9 = pnand %p4845_p8, %p4839_p5 }
  0x34   :  { %4849 = shalt.err (!%p4846_p9)
}
  0x35   :  { %23 = dma.hbm_to_vmem [thread:$0]  %s5126_s0, 128, %s21_s21, [#allocation3]  }
  0x36   :  { %s4850_s10 = scalar_lea.hbm %s5128_s2, 64 }
  0x37   :  { %p4851_p10 = scmp.ne.s32.totalorder %s5128_s2, %s4850_s10  ;;  %p4854_p11 = scmp.lt.u32.totalorder %s4850_s10, %s5128_s2 }
  0x39   :  { %p4856_p12 = pnand %p4854_p11, %p4851_p10 }
  0x3b   :  { %4859 = shalt.err (!%p4856_p12)
}
  0x3c   :  { %s4860_s15 = scalar_lea.vmem %s43_s23, 64  ;;  %p4865_p0 = scmp.lt.s32.totalorder %s43_s23, %s43_s23 }
  0x3d   :  { %p4861_p13 = scmp.ne.s32.totalorder %s43_s23, %s4860_s15  ;;  %p4866_p1 = scmp.lt.s32.totalorder %s4860_s15, %s4860_s15 }
  0x3f   :  { %p4867_p2 = por %p4866_p1, %p4865_p0 }
  0x41   :  { %p4868_p3 = pnand %p4867_p2, %p4861_p13 }
  0x43   :  { %4871 = shalt.err (!%p4868_p3)
}
  0x44   :  { %45 = dma.hbm_to_vmem [thread:$0]  %s5128_s2, 64, %s43_s23, [#allocation6]  }
  0x45   :  { %s4932_s1 = smov [#allocation10]   ;;  %s4872_s20 = scalar_lea.hbm %s5130_s4, 208 }
  0x46   :  { %s64_s17 = sshll.u32 %s4932_s1, 4  ;;  %p4873_p4 = scmp.ne.s32.totalorder %s5130_s4, %s4872_s20  ;;  %s65_s17 = int_to_ptr.vmem [resolvable:$true] %s64_s17 }
  0x47   :  { %p4876_p5 = scmp.lt.u32.totalorder %s4872_s20, %s5130_s4 }
  0x49   :  { %p4878_p6 = pnand %p4876_p5, %p4873_p4 }
  0x4b   :  { %4881 = shalt.err (!%p4878_p6)
}
  0x4c   :  { %s4882_s26 = scalar_lea.vmem %s65_s17, 208  ;;  %s4886_s2 = scalar_lea.vmem %s65_s17, 224 }
  0x4d   :  { %p4883_p7 = scmp.ne.s32.totalorder %s65_s17, %s4882_s26  ;;  %p4887_p8 = scmp.lt.s32.totalorder %s65_s17, %s65_s17 }
  0x4e   :  { %p4888_p9 = scmp.lt.s32.totalorder %s4886_s2, %s4882_s26 }
  0x50   :  { %p4889_p10 = por %p4888_p9, %p4887_p8 }
  0x52   :  { %p4890_p11 = pnand %p4889_p10, %p4883_p7 }
  0x54   :  { %4893 = shalt.err (!%p4890_p11)
}
  0x55   :  { %67 = dma.hbm_to_vmem [thread:$0]  %s5130_s4, 208, %s65_s17, [#allocation9]  }
  0x56   :  { %4916 = dma.done.wait [#allocation3], 128  }
  0x57   :  { %4917 = vsyncadd [#allocation3], 4294967168 }
  0x58   :  { %4918 = dma.done.wait [#allocation6], 2112  }
  0x59   :  { %4919 = vsyncadd [#allocation6], 4294965184 }
  0x5a   :  { %4920 = dma.done.wait [#allocation9], 53456  }
  0x5b   :  { %4921 = vsyncadd [#allocation9], 4294913840  ;;  %v4933_v0 = vmov 0.0   ;;  %v86_v1 = vld [vmem:[#allocation5 + $0x8] sm:$0xff]  ;;  %v85_v3 = vld [vmem:[#allocation5] sm:$0xff]  ;;  %vm123_vm0 = vcmask 261120  }
  0x5c   :  { %191 = vmatprep.mubr.f32.mxu0 %v4933_v0  ;;  %262 = vmatprep.mubr.f32.mxu1 %v4933_v0  ;;  %v90_v2 = vld [vmem:[#allocation5 + $0x28] sm:$0xff]  ;;  %v89_v5 = vld [vmem:[#allocation5 + $0x20] sm:$0xff]  ;;  %v88_v12 = vld [vmem:[#allocation5 + $0x18] sm:$0xff]  ;;  %s4934_s4 = smov [#allocation11]  }
  0x5d   :  { %v4061_v4 = vpack.c.bf16 %v90_v2, %v86_v1  ;;  %v94_v6 = vld [vmem:[#allocation5 + $0x48] sm:$0xff]  ;;  %v4063_v8 = vpack.c.bf16 %v89_v5, %v85_v3  ;;  %v93_v10 = vld [vmem:[#allocation5 + $0x40] sm:$0xff]  ;;  %v92_v13 = vld [vmem:[#allocation5 + $0x38] sm:$0xff]  ;;  %s3575_s28 = sshll.u32 %s4934_s4, 4  ;;  %s3576_s28 = int_to_ptr.vmem [resolvable:$true] %s3575_s28 }
  0x5e   :  { %v98_v7 = vld [vmem:[#allocation5 + $0x68] sm:$0xff]  ;;  %v97_v11 = vld [vmem:[#allocation5 + $0x60] sm:$0xff]  ;;  %v87_v14 = vld [vmem:[#allocation5 + $0x10] sm:$0xff]  ;;  %v4069_v16 = vpack.c.bf16 %v92_v13, %v88_v12  ;;  %s4894_s29 = scalar_lea.vmem %s3576_s28, 1664  ;;  %p4899_p13 = scmp.lt.s32.totalorder %s3576_s28, %s3576_s28 }
  0x5f   :  { %v4065_v9 = vpack.c.bf16 %v98_v7, %v94_v6  ;;  %4062 = vmatprep.subr.bf16.mxu0 %v4061_v4  ;;  %v4067_v15 = vpack.c.bf16 %v97_v11, %v93_v10  ;;  %v91_v17 = vld [vmem:[#allocation5 + $0x30] sm:$0xff]  ;;  %v96_v18 = vld [vmem:[#allocation5 + $0x58] sm:$0xff]  ;;  %v4127_v30 = vld [vmem:[#allocation8 + $0x8] ss:$52 sps:$4 sm:$0xff]   ;;  %p4895_p12 = scmp.ne.s32.totalorder %s3576_s28, %s4894_s29  ;;  %p4900_p0 = scmp.lt.s32.totalorder %s4894_s29, %s4894_s29 }
  0x60   :  { %4064 = vmatpush1.bf16.msra.mxu0 %v4063_v8  ;;  %v100_v19 = vld [vmem:[#allocation5 + $0x78] sm:$0xff]  ;;  %v4071_v20 = vpack.c.bf16 %v91_v17, %v87_v14  ;;  %v95_v22 = vld [vmem:[#allocation5 + $0x50] sm:$0xff]  ;;  %4070 = vmatprep.subr.bf16.mxu1 %v4069_v16  ;;  %v4130_v31 = vld [vmem:[#allocation8 + $0x68] ss:$52 sps:$4 sm:$0xff]  }
  0x61   :  { %4066 = vmatprep.subr.bf16.mxu0 %v4065_v9  ;;  %v4073_v21 = vpack.c.bf16 %v100_v19, %v96_v18  ;;  %v99_v23 = vld [vmem:[#allocation5 + $0x70] sm:$0xff]  ;;  %v84_v24 = vld [vmem:[#allocation2] sm:$0xff]  ;;  %v4151_v46 = vld [vmem:[#allocation8 + $0x1a8] ss:$52 sps:$4 sm:$0xff]   ;;  %p4901_p1 = por %p4900_p0, %p4899_p13 }
  0x62   :  { %v4126_v25 = vld [vmem:[#allocation8 + $0x4] ss:$52 sps:$4 sm:$0xff]   ;;  %4072 = vmatpush1.bf16.msra.mxu1 %v4071_v20  ;;  %v4075_v26 = vpack.c.bf16 %v99_v23, %v95_v22  ;;  %v4124_v27 = vld [vmem:[#allocation8] ss:$52 sps:$4 sm:$0xff]   ;;  %v4141_v36 = vld [vmem:[#allocation8 + $0xdc] ss:$52 sps:$4 sm:$0xff]  }
  0x63   :  { %4074 = vmatprep.subr.bf16.mxu1 %v4073_v21  ;;  %v4129_v28 = vld [vmem:[#allocation8 + $0xc] ss:$52 sps:$4 sm:$0xff]   ;;  %v4135_v32 = vld [vmem:[#allocation8 + $0x74] ss:$52 sps:$4 sm:$0xff]   ;;  %v4133_v34 = vld [vmem:[#allocation8 + $0x70] ss:$52 sps:$4 sm:$0xff]   ;;  %p4902_p2 = pnand %p4901_p1, %p4895_p12 }
  0x64   :  { %4068 = vmatpush1.bf16.msra.mxu0 %v4067_v15  ;;  %v4132_v29 = vld [vmem:[#allocation8 + $0x6c] ss:$52 sps:$4 sm:$0xff]   ;;  %v4138_v33 = vld [vmem:[#allocation8 + $0xd4] ss:$52 sps:$4 sm:$0xff]   ;;  %v4136_v35 = vld [vmem:[#allocation8 + $0xd0] ss:$52 sps:$4 sm:$0xff]  }
  0x65   :  { %2906 = vmatprep.subr.bf16.mxu0 %v4126_v25  ;;  %v4144_v37 = vld [vmem:[#allocation8 + $0x13c] ss:$52 sps:$4 sm:$0xff]   ;;  %v4139_v38 = vld [vmem:[#allocation8 + $0xd8] ss:$52 sps:$4 sm:$0xff]   ;;  %v4145_v42 = vld [vmem:[#allocation8 + $0x140] ss:$52 sps:$4 sm:$0xff]  }
  0x66   :  { %4076 = vmatpush1.bf16.msra.mxu1 %v4075_v26  ;;  %v4142_v39 = vld [vmem:[#allocation8 + $0x138] ss:$52 sps:$4 sm:$0xff]   ;;  %v4148_v43 = vld [vmem:[#allocation8 + $0x1a0] ss:$52 sps:$4 sm:$0xff]   ;;  %v4154_v47 = vld [vmem:[#allocation8 + $0x208] ss:$52 sps:$4 sm:$0xff]  }
  0x67   :  { %3586 = vmatmul.mubr.msk.f32.vlgmr.msra.gmra.mrb[0].mxu0 %vm123_vm0, %v84_v24  ;;  %2988 = vmatprep.subr.bf16.mxu1 %v4129_v28  ;;  %v4147_v40 = vld [vmem:[#allocation8 + $0x144] ss:$52 sps:$4 sm:$0xff]   ;;  %v4153_v44 = vld [vmem:[#allocation8 + $0x1ac] ss:$52 sps:$4 sm:$0xff]   ;;  %v4159_v48 = vld [vmem:[#allocation8 + $0x214] ss:$52 sps:$4 sm:$0xff]   ;;  %v103_v28 = vlaneseq }
  0x68   :  { %2907 = vmatpush1.bf16.msra.mxu0 %v4124_v27  ;;  %v4150_v41 = vld [vmem:[#allocation8 + $0x1a4] ss:$52 sps:$4 sm:$0xff]   ;;  %v4156_v45 = vld [vmem:[#allocation8 + $0x20c] ss:$52 sps:$4 sm:$0xff]   ;;  %v4162_v49 = vld [vmem:[#allocation8 + $0x274] ss:$52 sps:$4 sm:$0xff]  }
  0x69   :  { %2908 = vmatprep.subr.bf16.mxu0 %v4132_v29  ;;  %3587 = vmatmul.mubr.msk.f32.vlgmr.msra.gmra.mrb[0].mxu1 %vm123_vm0, %v84_v24  ;;  %v4157_v50 = vld [vmem:[#allocation8 + $0x210] ss:$52 sps:$4 sm:$0xff]   ;;  %v4163_v54 = vld [vmem:[#allocation8 + $0x278] ss:$52 sps:$4 sm:$0xff]   ;;  %v4169_v58 = vld [vmem:[#allocation8 + $0x2e0] ss:$52 sps:$4 sm:$0xff]  }
  0x6a   :  { %2989 = vmatpush1.bf16.msra.mxu1 %v4127_v30  ;;  %v4160_v51 = vld [vmem:[#allocation8 + $0x270] ss:$52 sps:$4 sm:$0xff]   ;;  %v4166_v55 = vld [vmem:[#allocation8 + $0x2d8] ss:$52 sps:$4 sm:$0xff]   ;;  %v4172_v59 = vld [vmem:[#allocation8 + $0x340] ss:$52 sps:$4 sm:$0xff]  }
  0x6b   :  { %2990 = vmatprep.subr.bf16.mxu1 %v4135_v32  ;;  %v4165_v52 = vld [vmem:[#allocation8 + $0x27c] ss:$52 sps:$4 sm:$0xff]   ;;  %v4171_v56 = vld [vmem:[#allocation8 + $0x2e4] ss:$52 sps:$4 sm:$0xff]   ;;  %v4177_v60 = vld [vmem:[#allocation8 + $0x34c] ss:$52 sps:$4 sm:$0xff]  }
  0x6c   :  { %2909 = vmatpush1.bf16.msra.mxu0 %v4130_v31  ;;  %v4168_v53 = vld [vmem:[#allocation8 + $0x2dc] ss:$52 sps:$4 sm:$0xff]   ;;  %v4174_v57 = vld [vmem:[#allocation8 + $0x344] ss:$52 sps:$4 sm:$0xff]   ;;  %v4180_v62 = vld [vmem:[#allocation8 + $0x3ac] ss:$52 sps:$4 sm:$0xff]  }
  0x6d   :  { %2910 = vmatprep.subr.bf16.mxu0 %v4138_v33  ;;  %v4175_v61 = vld [vmem:[#allocation8 + $0x348] ss:$52 sps:$4 sm:$0xff]   ;;  %v4181_v2 = vld [vmem:[#allocation8 + $0x3b0] ss:$52 sps:$4 sm:$0xff]   ;;  %v4187_v6 = vld [vmem:[#allocation8 + $0x418] ss:$52 sps:$4 sm:$0xff]  }
  0x6e   :  { %2991 = vmatpush1.bf16.msra.mxu1 %v4133_v34  ;;  %v4178_v63 = vld [vmem:[#allocation8 + $0x3a8] ss:$52 sps:$4 sm:$0xff]   ;;  %v4184_v3 = vld [vmem:[#allocation8 + $0x410] ss:$52 sps:$4 sm:$0xff]   ;;  %v4190_v7 = vld [vmem:[#allocation8 + $0x478] ss:$52 sps:$4 sm:$0xff]  }
  0x6f   :  { %2992 = vmatprep.subr.bf16.mxu1 %v4141_v36  ;;  %v4183_v0 = vld [vmem:[#allocation8 + $0x3b4] ss:$52 sps:$4 sm:$0xff]   ;;  %v4189_v4 = vld [vmem:[#allocation8 + $0x41c] ss:$52 sps:$4 sm:$0xff]   ;;  %v4195_v8 = vld [vmem:[#allocation8 + $0x484] ss:$52 sps:$4 sm:$0xff]  }
  0x70   :  { %2911 = vmatpush1.bf16.msra.mxu0 %v4136_v35  ;;  %v4186_v1 = vld [vmem:[#allocation8 + $0x414] ss:$52 sps:$4 sm:$0xff]   ;;  %v4192_v5 = vld [vmem:[#allocation8 + $0x47c] ss:$52 sps:$4 sm:$0xff]   ;;  %v4198_v9 = vld [vmem:[#allocation8 + $0x4e4] ss:$52 sps:$4 sm:$0xff]  }
  0x71   :  { %2912 = vmatprep.subr.bf16.mxu0 %v4144_v37  ;;  %v4193_v10 = vld [vmem:[#allocation8 + $0x480] ss:$52 sps:$4 sm:$0xff]   ;;  %v4199_v14 = vld [vmem:[#allocation8 + $0x4e8] ss:$52 sps:$4 sm:$0xff]   ;;  %v4205_v17 = vld [vmem:[#allocation8 + $0x550] ss:$52 sps:$4 sm:$0xff]  }
  0x72   :  { %2993 = vmatpush1.bf16.msra.mxu1 %v4139_v38  ;;  %v4196_v11 = vld [vmem:[#allocation8 + $0x4e0] ss:$52 sps:$4 sm:$0xff]   ;;  %v4202_v15 = vld [vmem:[#allocation8 + $0x548] ss:$52 sps:$4 sm:$0xff]   ;;  %v4208_v20 = vld [vmem:[#allocation8 + $0x5b0] ss:$52 sps:$4 sm:$0xff]  }
  0x73   :  { %2994 = vmatprep.subr.bf16.mxu1 %v4147_v40  ;;  %v4201_v12 = vld [vmem:[#allocation8 + $0x4ec] ss:$52 sps:$4 sm:$0xff]   ;;  %v4207_v16 = vld [vmem:[#allocation8 + $0x554] ss:$52 sps:$4 sm:$0xff]   ;;  %v4213_v19 = vld [vmem:[#allocation8 + $0x5bc] ss:$52 sps:$4 sm:$0xff]  }
  0x74   :  { %2913 = vmatpush1.bf16.msra.mxu0 %v4142_v39  ;;  %v4204_v13 = vld [vmem:[#allocation8 + $0x54c] ss:$52 sps:$4 sm:$0xff]   ;;  %v4210_v18 = vld [vmem:[#allocation8 + $0x5b4] ss:$52 sps:$4 sm:$0xff]   ;;  %v4216_v22 = vld [vmem:[#allocation8 + $0x61c] ss:$52 sps:$4 sm:$0xff]  }
  0x75   :  { %2914 = vmatprep.subr.bf16.mxu0 %v4150_v41  ;;  %v4211_v21 = vld [vmem:[#allocation8 + $0x5b8] ss:$52 sps:$4 sm:$0xff]   ;;  %v4217_v25 = vld [vmem:[#allocation8 + $0x620] ss:$52 sps:$4 sm:$0xff]   ;;  %v5025_v29 = vshrl.u32 %v103_v28, 7 }
  0x76   :  { %2995 = vmatpush1.bf16.msra.mxu1 %v4145_v42  ;;  %v4219_v23 = vld [vmem:[#allocation8 + $0x624] ss:$52 sps:$4 sm:$0xff]   ;;  %v4225_v27 = vld [vmem:[#allocation8 + $0x68c] ss:$52 sps:$4 sm:$0xff]   ;;  %v5030_v31 = vld [vmem:[#allocation7] sm:$0xf] }
  0x77   :  { %2996 = vmatprep.subr.bf16.mxu1 %v4153_v44  ;;  %v4214_v24 = vld [vmem:[#allocation8 + $0x618] ss:$52 sps:$4 sm:$0xff]   ;;  %v5028_v30 = vsub.s32 0, %v5025_v29  ;;  %v5033_v32 = vsub.s32 1, %v5025_v29  ;;  %v5038_v34 = vsub.s32 3, %v5025_v29 }
  0x78   :  { %2915 = vmatpush1.bf16.msra.mxu0 %v4148_v43  ;;  %v4222_v26 = vld [vmem:[#allocation8 + $0x684] ss:$52 sps:$4 sm:$0xff]   ;;  %v4288_v28 = vld [vmem:[#allocation8 + $0xafc] ss:$52 sps:$4 sm:$0xff]  }
  0x79   :  { %2916 = vmatprep.subr.bf16.mxu0 %v4156_v45  ;;  %v106_v33 = vrot.slane %v5030_v31, %v5028_v30  ;;  %v110_v35 = vrot.slane %v5030_v31, %v5033_v32  ;;  %v118_v39 = vrot.slane %v5030_v31, %v5038_v34 }
  0x7a   :  { %2997 = vmatpush1.bf16.msra.mxu1 %v4151_v46 }
  0x7b   :  { %2998 = vmatprep.subr.bf16.mxu1 %v4159_v48  ;;  %v4223_v48 = vld [vmem:[#allocation8 + $0x688] ss:$52 sps:$4 sm:$0xff]  }
  0x7c   :  { %2917 = vmatpush1.bf16.msra.mxu0 %v4154_v47  ;;  %v4220_v47 = vld [vmem:[#allocation8 + $0x680] ss:$52 sps:$4 sm:$0xff]  }
  0x7d   :  { %2918 = vmatprep.subr.bf16.mxu0 %v4162_v49 }
  0x7e   :  { %2999 = vmatpush1.bf16.msra.mxu1 %v4157_v50  ;;  %v4228_v50 = vld [vmem:[#allocation8 + $0x6ec] ss:$52 sps:$4 sm:$0xff]  }
  0x7f   :  { %3000 = vmatprep.subr.bf16.mxu1 %v4165_v52 }
  0x80   :  { %2919 = vmatpush1.bf16.msra.mxu0 %v4160_v51  ;;  %v4231_v51 = vld [vmem:[#allocation8 + $0x6f4] ss:$52 sps:$4 sm:$0xff]  }
  0x81   :  { %2920 = vmatprep.subr.bf16.mxu0 %v4168_v53 }
  0x82   :  { %3001 = vmatpush1.bf16.msra.mxu1 %v4163_v54  ;;  %v4226_v54 = vld [vmem:[#allocation8 + $0x6e8] ss:$52 sps:$4 sm:$0xff]  }
  0x83   :  { %3002 = vmatprep.subr.bf16.mxu1 %v4171_v56  ;;  %v4234_v56 = vld [vmem:[#allocation8 + $0x754] ss:$52 sps:$4 sm:$0xff]  }
  0x84   :  { %2921 = vmatpush1.bf16.msra.mxu0 %v4166_v55  ;;  %v4229_v55 = vld [vmem:[#allocation8 + $0x6f0] ss:$52 sps:$4 sm:$0xff]  }
  0x85   :  { %2922 = vmatprep.subr.bf16.mxu0 %v4174_v57  ;;  %v4237_v57 = vld [vmem:[#allocation8 + $0x75c] ss:$52 sps:$4 sm:$0xff]  }
  0x86   :  { %3003 = vmatpush1.bf16.msra.mxu1 %v4169_v58  ;;  %v4232_v58 = vld [vmem:[#allocation8 + $0x750] ss:$52 sps:$4 sm:$0xff]  }
  0x87   :  { %3004 = vmatprep.subr.bf16.mxu1 %v4177_v60  ;;  %v4240_v60 = vld [vmem:[#allocation8 + $0x7bc] ss:$52 sps:$4 sm:$0xff]  }
  0x88   :  { %2923 = vmatpush1.bf16.msra.mxu0 %v4172_v59  ;;  %v4235_v59 = vld [vmem:[#allocation8 + $0x758] ss:$52 sps:$4 sm:$0xff]  }
  0x89   :  { %2924 = vmatprep.subr.bf16.mxu0 %v4180_v62  ;;  %v4238_v62 = vld [vmem:[#allocation8 + $0x7b8] ss:$52 sps:$4 sm:$0xff]  }
  0x8a   :  { %3005 = vmatpush1.bf16.msra.mxu1 %v4175_v61  ;;  %v4243_v61 = vld [vmem:[#allocation8 + $0x7c4] ss:$52 sps:$4 sm:$0xff]  }
  0x8b   :  { %3006 = vmatprep.subr.bf16.mxu1 %v4183_v0  ;;  %v4246_v0 = vld [vmem:[#allocation8 + $0x824] ss:$52 sps:$4 sm:$0xff]  }
  0x8c   :  { %2925 = vmatpush1.bf16.msra.mxu0 %v4178_v63  ;;  %v4241_v63 = vld [vmem:[#allocation8 + $0x7c0] ss:$52 sps:$4 sm:$0xff]  }
  0x8d   :  { %2926 = vmatprep.subr.bf16.mxu0 %v4186_v1  ;;  %v4249_v1 = vld [vmem:[#allocation8 + $0x82c] ss:$52 sps:$4 sm:$0xff]  }
  0x8e   :  { %3007 = vmatpush1.bf16.msra.mxu1 %v4181_v2  ;;  %v4244_v2 = vld [vmem:[#allocation8 + $0x820] ss:$52 sps:$4 sm:$0xff]  }
  0x8f   :  { %3008 = vmatprep.subr.bf16.mxu1 %v4189_v4  ;;  %v4252_v4 = vld [vmem:[#allocation8 + $0x88c] ss:$52 sps:$4 sm:$0xff]  }
  0x90   :  { %2927 = vmatpush1.bf16.msra.mxu0 %v4184_v3  ;;  %v4247_v3 = vld [vmem:[#allocation8 + $0x828] ss:$52 sps:$4 sm:$0xff]  }
  0x91   :  { %2928 = vmatprep.subr.bf16.mxu0 %v4192_v5  ;;  %v4255_v5 = vld [vmem:[#allocation8 + $0x894] ss:$52 sps:$4 sm:$0xff]  }
  0x92   :  { %3009 = vmatpush1.bf16.msra.mxu1 %v4187_v6  ;;  %v4250_v6 = vld [vmem:[#allocation8 + $0x888] ss:$52 sps:$4 sm:$0xff]  }
  0x93   :  { %3010 = vmatprep.subr.bf16.mxu1 %v4195_v8  ;;  %v4258_v8 = vld [vmem:[#allocation8 + $0x8f4] ss:$52 sps:$4 sm:$0xff]  }
  0x94   :  { %2929 = vmatpush1.bf16.msra.mxu0 %v4190_v7  ;;  %v4253_v7 = vld [vmem:[#allocation8 + $0x890] ss:$52 sps:$4 sm:$0xff]  }
  0x95   :  { %2930 = vmatprep.subr.bf16.mxu0 %v4198_v9  ;;  %v4261_v9 = vld [vmem:[#allocation8 + $0x8fc] ss:$52 sps:$4 sm:$0xff]  }
  0x96   :  { %3011 = vmatpush1.bf16.msra.mxu1 %v4193_v10  ;;  %v4256_v10 = vld [vmem:[#allocation8 + $0x8f0] ss:$52 sps:$4 sm:$0xff]  }
  0x97   :  { %3012 = vmatprep.subr.bf16.mxu1 %v4201_v12  ;;  %v4264_v12 = vld [vmem:[#allocation8 + $0x95c] ss:$52 sps:$4 sm:$0xff]  }
  0x98   :  { %2931 = vmatpush1.bf16.msra.mxu0 %v4196_v11  ;;  %v4259_v11 = vld [vmem:[#allocation8 + $0x8f8] ss:$52 sps:$4 sm:$0xff]  }
  0x99   :  { %2932 = vmatprep.subr.bf16.mxu0 %v4204_v13  ;;  %v4267_v13 = vld [vmem:[#allocation8 + $0x964] ss:$52 sps:$4 sm:$0xff]  }
  0x9a   :  { %3013 = vmatpush1.bf16.msra.mxu1 %v4199_v14  ;;  %v4262_v14 = vld [vmem:[#allocation8 + $0x958] ss:$52 sps:$4 sm:$0xff]  }
  0x9b   :  { %3014 = vmatprep.subr.bf16.mxu1 %v4207_v16  ;;  %v4270_v16 = vld [vmem:[#allocation8 + $0x9c4] ss:$52 sps:$4 sm:$0xff]  }
  0x9c   :  { %2933 = vmatpush1.bf16.msra.mxu0 %v4202_v15  ;;  %v4265_v15 = vld [vmem:[#allocation8 + $0x960] ss:$52 sps:$4 sm:$0xff]  }
  0x9d   :  { %2934 = vmatprep.subr.bf16.mxu0 %v4210_v18  ;;  %v4268_v18 = vld [vmem:[#allocation8 + $0x9c0] ss:$52 sps:$4 sm:$0xff]  }
  0x9e   :  { %3015 = vmatpush1.bf16.msra.mxu1 %v4205_v17  ;;  %v4273_v17 = vld [vmem:[#allocation8 + $0x9cc] ss:$52 sps:$4 sm:$0xff]  }
  0x9f   :  { %3016 = vmatprep.subr.bf16.mxu1 %v4213_v19  ;;  %v4271_v19 = vld [vmem:[#allocation8 + $0x9c8] ss:$52 sps:$4 sm:$0xff]  }
  0xa0   :  { %2935 = vmatpush1.bf16.msra.mxu0 %v4208_v20  ;;  %v4276_v20 = vld [vmem:[#allocation8 + $0xa2c] ss:$52 sps:$4 sm:$0xff]  }
  0xa1   :  { %2936 = vmatprep.subr.bf16.mxu0 %v4216_v22  ;;  %v4274_v22 = vld [vmem:[#allocation8 + $0xa28] ss:$52 sps:$4 sm:$0xff]  }
  0xa2   :  { %3017 = vmatpush1.bf16.msra.mxu1 %v4211_v21  ;;  %v4279_v21 = vld [vmem:[#allocation8 + $0xa34] ss:$52 sps:$4 sm:$0xff]  }
  0xa3   :  { %3018 = vmatprep.subr.bf16.mxu1 %v4219_v23  ;;  %v4277_v23 = vld [vmem:[#allocation8 + $0xa30] ss:$52 sps:$4 sm:$0xff]  }
  0xa4   :  { %2937 = vmatpush1.bf16.msra.mxu0 %v4214_v24  ;;  %v4282_v24 = vld [vmem:[#allocation8 + $0xa94] ss:$52 sps:$4 sm:$0xff]  }
  0xa5   :  { %2947 = vmatprep.subr.bf16.mxu0 %v4222_v26  ;;  %v4280_v26 = vld [vmem:[#allocation8 + $0xa90] ss:$52 sps:$4 sm:$0xff]  }
  0xa6   :  { %3019 = vmatpush1.bf16.msra.mxu1 %v4217_v25  ;;  %v4285_v25 = vld [vmem:[#allocation8 + $0xa9c] ss:$52 sps:$4 sm:$0xff]  }
  0xa7   :  { %3029 = vmatprep.subr.bf16.mxu1 %v4225_v27  ;;  %v4283_v27 = vld [vmem:[#allocation8 + $0xa98] ss:$52 sps:$4 sm:$0xff]  }
 0x13a   :  { %v193_v36 = vpop.f32.mrb[0].mxu0 }
 0x13b   :  { %v194_v37 = vadd.f32 %v193_v36, %v106_v33  ;;  %v195_v38 = vpop.f32.mrb[1].mxu0  ;;  %v4291_v33 = vld [vmem:[#allocation8 + $0xb04] ss:$52 sps:$4 sm:$0xff]   ;;  %v4289_v36 = vld [vmem:[#allocation8 + $0xb00] ss:$52 sps:$4 sm:$0xff]  }
 0x13c   :  { %v196_v40 = vadd.f32 %v195_v38, %v110_v35  ;;  %v5044_v42 = vpop.f32.mrb[0].mxu1  ;;  %v4286_v35 = vld [vmem:[#allocation8 + $0xaf8] ss:$52 sps:$4 sm:$0xff]  }
 0x13d   :  { %v269_v41 = vmax.f32 %v194_v37, 0.0  ;;  %v266_v44 = vpop.f32.mrb[1].mxu1  ;;  %v4294_v37 = vld [vmem:[#allocation8 + $0xb64] ss:$52 sps:$4 sm:$0xff]   ;;  %v4297_v38 = vld [vmem:[#allocation8 + $0xb6c] ss:$52 sps:$4 sm:$0xff]  }
 0x13e   :  { %v270_v43 = vmax.f32 %v196_v40, 0.0  ;;  %v267_v45 = vadd.f32 %v266_v44, %v118_v39  ;;  %v5059_v39 = vsub.s32 2, %v5025_v29  ;;  %v4292_v40 = vld [vmem:[#allocation8 + $0xb60] ss:$52 sps:$4 sm:$0xff]  }
 0x13f   :  { %v5048_v49 = vpack.c.bf16 %v269_v41, %v269_v41  ;;  %v4295_v41 = vld [vmem:[#allocation8 + $0xb68] ss:$52 sps:$4 sm:$0xff]  }
 0x140   :  { %v5046_v46 = vpack.c.bf16 %v270_v43, %v270_v43  ;;  %v272_v52 = vmax.f32 %v267_v45, 0.0  ;;  %v4300_v43 = vld [vmem:[#allocation8 + $0xbcc] ss:$52 sps:$4 sm:$0xff]   ;;  %v4303_v44 = vld [vmem:[#allocation8 + $0xbd4] ss:$52 sps:$4 sm:$0xff]   ;;  %v114_v45 = vrot.slane %v5030_v31, %v5059_v39 }
 0x141   :  { %v4310_v31 = vld [vmem:[#allocation8 + $0xc98] ss:$52 sps:$4 sm:$0xff]  }
 0x142   :  { %2938 = vmatprep.mubr.bf16.mxu0 %v5046_v46  ;;  %3020 = vmatprep.mubr.bf16.mxu1 %v5046_v46  ;;  %v5054_v53 = vpack.c.bf16 %v272_v52, %v272_v52  ;;  %v265_v52 = vadd.f32 %v5044_v42, %v114_v45  ;;  %v4316_v42 = vld [vmem:[#allocation8 + $0x10] ss:$52 sps:$4 sm:$0xff]   ;;  %v4376_v45 = vld [vmem:[#allocation8 + $0x420] ss:$52 sps:$4 sm:$0xff]  }
 0x143   :  { %2939 = vmatmul.mubr.bf16.vlgmr.msra.gmra.mrb[4].mxu0 %v5048_v49  ;;  %3021 = vmatmul.mubr.bf16.vlgmr.msra.gmra.mrb[4].mxu1 %v5048_v49 }
 0x144   :  { %2948 = vmatpush1.bf16.msra.mxu0 %v4220_v47  ;;  %3030 = vmatpush1.bf16.msra.mxu1 %v4223_v48  ;;  %v4298_v47 = vld [vmem:[#allocation8 + $0xbc8] ss:$52 sps:$4 sm:$0xff]   ;;  %v4301_v48 = vld [vmem:[#allocation8 + $0xbd0] ss:$52 sps:$4 sm:$0xff]  }
 0x145   :  { %2949 = vmatprep.subr.bf16.mxu0 %v4228_v50  ;;  %3031 = vmatprep.subr.bf16.mxu1 %v4231_v51  ;;  %v4306_v50 = vld [vmem:[#allocation8 + $0xc34] ss:$52 sps:$4 sm:$0xff]   ;;  %v4309_v51 = vld [vmem:[#allocation8 + $0xc3c] ss:$52 sps:$4 sm:$0xff]  }
 0x146   :  { %2979 = vmatprep.mubr.bf16.mxu0 %v5054_v53  ;;  %3061 = vmatprep.mubr.bf16.mxu1 %v5054_v53 }
 0x148   :  { %2950 = vmatpush1.bf16.msra.mxu0 %v4226_v54  ;;  %3032 = vmatpush1.bf16.msra.mxu1 %v4229_v55  ;;  %v4304_v54 = vld [vmem:[#allocation8 + $0xc30] ss:$52 sps:$4 sm:$0xff]   ;;  %v4307_v55 = vld [vmem:[#allocation8 + $0xc38] ss:$52 sps:$4 sm:$0xff]  }
 0x149   :  { %2951 = vmatprep.subr.bf16.mxu0 %v4234_v56  ;;  %3033 = vmatprep.subr.bf16.mxu1 %v4237_v57  ;;  %v4312_v56 = vld [vmem:[#allocation8 + $0xc9c] ss:$52 sps:$4 sm:$0xff]   ;;  %v4315_v57 = vld [vmem:[#allocation8 + $0xca4] ss:$52 sps:$4 sm:$0xff]  }
 0x14c   :  { %2952 = vmatpush1.bf16.msra.mxu0 %v4232_v58  ;;  %3034 = vmatpush1.bf16.msra.mxu1 %v4235_v59  ;;  %v271_v58 = vmax.f32 %v265_v52, 0.0  ;;  %v4313_v59 = vld [vmem:[#allocation8 + $0xca0] ss:$52 sps:$4 sm:$0xff]   ;;  %v4385_v52 = vld [vmem:[#allocation8 + $0x490] ss:$52 sps:$4 sm:$0xff]  }
 0x14d   :  { %2953 = vmatprep.subr.bf16.mxu0 %v4240_v60  ;;  %3035 = vmatprep.subr.bf16.mxu1 %v4243_v61  ;;  %v4318_v60 = vld [vmem:[#allocation8 + $0x14] ss:$52 sps:$4 sm:$0xff]   ;;  %v4321_v61 = vld [vmem:[#allocation8 + $0x1c] ss:$52 sps:$4 sm:$0xff]  }
 0x150   :  { %2954 = vmatpush1.bf16.msra.mxu0 %v4238_v62  ;;  %3036 = vmatpush1.bf16.msra.mxu1 %v4241_v63  ;;  %v5064_v62 = vpack.c.bf16 %v271_v58, %v271_v58  ;;  %v4319_v63 = vld [vmem:[#allocation8 + $0x18] ss:$52 sps:$4 sm:$0xff]   ;;  %v4396_v58 = vld [vmem:[#allocation8 + $0x55c] ss:$52 sps:$4 sm:$0xff]  }
 0x151   :  { %2955 = vmatprep.subr.bf16.mxu0 %v4246_v0  ;;  %3037 = vmatprep.subr.bf16.mxu1 %v4249_v1  ;;  %v4324_v0 = vld [vmem:[#allocation8 + $0x7c] ss:$52 sps:$4 sm:$0xff]   ;;  %v4327_v1 = vld [vmem:[#allocation8 + $0x84] ss:$52 sps:$4 sm:$0xff]  }
 0x154   :  { %2956 = vmatpush1.bf16.msra.mxu0 %v4244_v2  ;;  %3038 = vmatpush1.bf16.msra.mxu1 %v4247_v3  ;;  %v4322_v2 = vld [vmem:[#allocation8 + $0x78] ss:$52 sps:$4 sm:$0xff]   ;;  %v4325_v3 = vld [vmem:[#allocation8 + $0x80] ss:$52 sps:$4 sm:$0xff]  }
 0x155   :  { %2957 = vmatprep.subr.bf16.mxu0 %v4252_v4  ;;  %3039 = vmatprep.subr.bf16.mxu1 %v4255_v5  ;;  %v4330_v4 = vld [vmem:[#allocation8 + $0xe4] ss:$52 sps:$4 sm:$0xff]   ;;  %v4333_v5 = vld [vmem:[#allocation8 + $0xec] ss:$52 sps:$4 sm:$0xff]  }
 0x158   :  { %2958 = vmatpush1.bf16.msra.mxu0 %v4250_v6  ;;  %3040 = vmatpush1.bf16.msra.mxu1 %v4253_v7  ;;  %v4328_v6 = vld [vmem:[#allocation8 + $0xe0] ss:$52 sps:$4 sm:$0xff]   ;;  %v4331_v7 = vld [vmem:[#allocation8 + $0xe8] ss:$52 sps:$4 sm:$0xff]  }
 0x159   :  { %2959 = vmatprep.subr.bf16.mxu0 %v4258_v8  ;;  %3041 = vmatprep.subr.bf16.mxu1 %v4261_v9  ;;  %v4336_v8 = vld [vmem:[#allocation8 + $0x14c] ss:$52 sps:$4 sm:$0xff]   ;;  %v4339_v9 = vld [vmem:[#allocation8 + $0x154] ss:$52 sps:$4 sm:$0xff]  }
 0x15c   :  { %2960 = vmatpush1.bf16.msra.mxu0 %v4256_v10  ;;  %3042 = vmatpush1.bf16.msra.mxu1 %v4259_v11  ;;  %v4334_v10 = vld [vmem:[#allocation8 + $0x148] ss:$52 sps:$4 sm:$0xff]   ;;  %v4337_v11 = vld [vmem:[#allocation8 + $0x150] ss:$52 sps:$4 sm:$0xff]  }
 0x15d   :  { %2961 = vmatprep.subr.bf16.mxu0 %v4264_v12  ;;  %3043 = vmatprep.subr.bf16.mxu1 %v4267_v13  ;;  %v4342_v12 = vld [vmem:[#allocation8 + $0x1b4] ss:$52 sps:$4 sm:$0xff]   ;;  %v4345_v13 = vld [vmem:[#allocation8 + $0x1bc] ss:$52 sps:$4 sm:$0xff]  }
 0x160   :  { %2962 = vmatpush1.bf16.msra.mxu0 %v4262_v14  ;;  %3044 = vmatpush1.bf16.msra.mxu1 %v4265_v15  ;;  %v4340_v14 = vld [vmem:[#allocation8 + $0x1b0] ss:$52 sps:$4 sm:$0xff]   ;;  %v4343_v15 = vld [vmem:[#allocation8 + $0x1b8] ss:$52 sps:$4 sm:$0xff]  }
 0x161   :  { %2963 = vmatprep.subr.bf16.mxu0 %v4270_v16  ;;  %3045 = vmatprep.subr.bf16.mxu1 %v4273_v17  ;;  %v4348_v16 = vld [vmem:[#allocation8 + $0x21c] ss:$52 sps:$4 sm:$0xff]   ;;  %v4351_v17 = vld [vmem:[#allocation8 + $0x224] ss:$52 sps:$4 sm:$0xff]  }
 0x164   :  { %2964 = vmatpush1.bf16.msra.mxu0 %v4268_v18  ;;  %3046 = vmatpush1.bf16.msra.mxu1 %v4271_v19  ;;  %v4346_v18 = vld [vmem:[#allocation8 + $0x218] ss:$52 sps:$4 sm:$0xff]   ;;  %v4349_v19 = vld [vmem:[#allocation8 + $0x220] ss:$52 sps:$4 sm:$0xff]  }
 0x165   :  { %2965 = vmatprep.subr.bf16.mxu0 %v4276_v20  ;;  %3047 = vmatprep.subr.bf16.mxu1 %v4279_v21  ;;  %v4354_v20 = vld [vmem:[#allocation8 + $0x284] ss:$52 sps:$4 sm:$0xff]   ;;  %v4357_v21 = vld [vmem:[#allocation8 + $0x28c] ss:$52 sps:$4 sm:$0xff]  }
 0x168   :  { %2966 = vmatpush1.bf16.msra.mxu0 %v4274_v22  ;;  %3048 = vmatpush1.bf16.msra.mxu1 %v4277_v23  ;;  %v4352_v22 = vld [vmem:[#allocation8 + $0x280] ss:$52 sps:$4 sm:$0xff]   ;;  %v4355_v23 = vld [vmem:[#allocation8 + $0x288] ss:$52 sps:$4 sm:$0xff]  }
 0x169   :  { %2967 = vmatprep.subr.bf16.mxu0 %v4282_v24  ;;  %3049 = vmatprep.subr.bf16.mxu1 %v4285_v25  ;;  %v4360_v24 = vld [vmem:[#allocation8 + $0x2ec] ss:$52 sps:$4 sm:$0xff]   ;;  %v4363_v25 = vld [vmem:[#allocation8 + $0x2f4] ss:$52 sps:$4 sm:$0xff]  }
 0x16c   :  { %2968 = vmatpush1.bf16.msra.mxu0 %v4280_v26  ;;  %3050 = vmatpush1.bf16.msra.mxu1 %v4283_v27  ;;  %v4358_v26 = vld [vmem:[#allocation8 + $0x2e8] ss:$52 sps:$4 sm:$0xff]   ;;  %v4361_v27 = vld [vmem:[#allocation8 + $0x2f0] ss:$52 sps:$4 sm:$0xff]  }
 0x16d   :  { %2969 = vmatprep.subr.bf16.mxu0 %v4288_v28  ;;  %3051 = vmatprep.subr.bf16.mxu1 %v4291_v33  ;;  %v4366_v28 = vld [vmem:[#allocation8 + $0x354] ss:$52 sps:$4 sm:$0xff]   ;;  %v4369_v33 = vld [vmem:[#allocation8 + $0x35c] ss:$52 sps:$4 sm:$0xff]  }
 0x170   :  { %2970 = vmatpush1.bf16.msra.mxu0 %v4286_v35  ;;  %3052 = vmatpush1.bf16.msra.mxu1 %v4289_v36  ;;  %v4364_v35 = vld [vmem:[#allocation8 + $0x350] ss:$52 sps:$4 sm:$0xff]   ;;  %v4367_v36 = vld [vmem:[#allocation8 + $0x358] ss:$52 sps:$4 sm:$0xff]  }
 0x171   :  { %2971 = vmatprep.subr.bf16.mxu0 %v4294_v37  ;;  %3053 = vmatprep.subr.bf16.mxu1 %v4297_v38  ;;  %v4372_v37 = vld [vmem:[#allocation8 + $0x3bc] ss:$52 sps:$4 sm:$0xff]   ;;  %v4375_v38 = vld [vmem:[#allocation8 + $0x3c4] ss:$52 sps:$4 sm:$0xff]  }
 0x174   :  { %2972 = vmatpush1.bf16.msra.mxu0 %v4292_v40  ;;  %3054 = vmatpush1.bf16.msra.mxu1 %v4295_v41  ;;  %v4370_v40 = vld [vmem:[#allocation8 + $0x3b8] ss:$52 sps:$4 sm:$0xff]   ;;  %v4373_v41 = vld [vmem:[#allocation8 + $0x3c0] ss:$52 sps:$4 sm:$0xff]  }
 0x175   :  { %2973 = vmatprep.subr.bf16.mxu0 %v4300_v43  ;;  %3055 = vmatprep.subr.bf16.mxu1 %v4303_v44  ;;  %v4378_v43 = vld [vmem:[#allocation8 + $0x424] ss:$52 sps:$4 sm:$0xff]   ;;  %v4381_v44 = vld [vmem:[#allocation8 + $0x42c] ss:$52 sps:$4 sm:$0xff]  }
 0x178   :  { %2974 = vmatpush1.bf16.msra.mxu0 %v4298_v47  ;;  %3056 = vmatpush1.bf16.msra.mxu1 %v4301_v48  ;;  %v4379_v47 = vld [vmem:[#allocation8 + $0x428] ss:$52 sps:$4 sm:$0xff]   ;;  %v4384_v48 = vld [vmem:[#allocation8 + $0x48c] ss:$52 sps:$4 sm:$0xff]  }
 0x179   :  { %2975 = vmatprep.subr.bf16.mxu0 %v4306_v50  ;;  %3057 = vmatprep.subr.bf16.mxu1 %v4309_v51  ;;  %v4387_v50 = vld [vmem:[#allocation8 + $0x494] ss:$52 sps:$4 sm:$0xff]  }
 0x17a   :  { %v4382_v51 = vld [vmem:[#allocation8 + $0x488] ss:$52 sps:$4 sm:$0xff]  }
 0x17c   :  { %2976 = vmatpush1.bf16.msra.mxu0 %v4304_v54  ;;  %3058 = vmatpush1.bf16.msra.mxu1 %v4307_v55  ;;  %v4390_v54 = vld [vmem:[#allocation8 + $0x4f4] ss:$52 sps:$4 sm:$0xff]   ;;  %v4393_v55 = vld [vmem:[#allocation8 + $0x4fc] ss:$52 sps:$4 sm:$0xff]  }
 0x17d   :  { %2977 = vmatprep.subr.bf16.mxu0 %v4312_v56  ;;  %3059 = vmatprep.subr.bf16.mxu1 %v4315_v57  ;;  %v4388_v56 = vld [vmem:[#allocation8 + $0x4f0] ss:$52 sps:$4 sm:$0xff]   ;;  %v4391_v57 = vld [vmem:[#allocation8 + $0x4f8] ss:$52 sps:$4 sm:$0xff]  }
 0x180   :  { %2978 = vmatpush1.bf16.msra.mxu0 %v4310_v31  ;;  %3060 = vmatpush1.bf16.msra.mxu1 %v4313_v59  ;;  %v4399_v31 = vld [vmem:[#allocation8 + $0x564] ss:$52 sps:$4 sm:$0xff]  }
 0x181   :  { %3070 = vmatprep.subr.bf16.mxu0 %v4318_v60  ;;  %3152 = vmatprep.subr.bf16.mxu1 %v4321_v61  ;;  %v4394_v59 = vld [vmem:[#allocation8 + $0x558] ss:$52 sps:$4 sm:$0xff]   ;;  %v4397_v60 = vld [vmem:[#allocation8 + $0x560] ss:$52 sps:$4 sm:$0xff]  }
 0x182   :  { %v4402_v61 = vld [vmem:[#allocation8 + $0x5c4] ss:$52 sps:$4 sm:$0xff]  }
 0x183   :  { %2980 = vmatmul.mubr.bf16.vlgmr.msra.gmra.mrb[4].mxu0 %v5064_v62  ;;  %3062 = vmatmul.mubr.bf16.vlgmr.msra.gmra.mrb[4].mxu1 %v5064_v62 }
 0x184   :  { %3071 = vmatpush1.bf16.msra.mxu0 %v4316_v42  ;;  %3102 = vmatprep.mubr.bf16.mxu0 %v5046_v46  ;;  %v4405_v42 = vld [vmem:[#allocation8 + $0x5cc] ss:$52 sps:$4 sm:$0xff]  }
 0x185   :  { %3153 = vmatpush1.bf16.msra.mxu1 %v4319_v63  ;;  %3184 = vmatprep.mubr.bf16.mxu1 %v5046_v46  ;;  %v4400_v63 = vld [vmem:[#allocation8 + $0x5c0] ss:$52 sps:$4 sm:$0xff]  }
 0x186   :  { %3072 = vmatprep.subr.bf16.mxu0 %v4324_v0  ;;  %3154 = vmatprep.subr.bf16.mxu1 %v4327_v1  ;;  %v4403_v0 = vld [vmem:[#allocation8 + $0x5c8] ss:$52 sps:$4 sm:$0xff]   ;;  %v4408_v1 = vld [vmem:[#allocation8 + $0x62c] ss:$52 sps:$4 sm:$0xff]  }
 0x188   :  { %3073 = vmatpush1.bf16.msra.mxu0 %v4322_v2  ;;  %v4411_v2 = vld [vmem:[#allocation8 + $0x634] ss:$52 sps:$4 sm:$0xff]  }
 0x189   :  { %3155 = vmatpush1.bf16.msra.mxu1 %v4325_v3  ;;  %3074 = vmatprep.subr.bf16.mxu0 %v4330_v4  ;;  %v4406_v3 = vld [vmem:[#allocation8 + $0x628] ss:$52 sps:$4 sm:$0xff]   ;;  %v4409_v4 = vld [vmem:[#allocation8 + $0x630] ss:$52 sps:$4 sm:$0xff]  }
 0x18a   :  { %3156 = vmatprep.subr.bf16.mxu1 %v4333_v5  ;;  %v4414_v5 = vld [vmem:[#allocation8 + $0x694] ss:$52 sps:$4 sm:$0xff]  }
 0x18c   :  { %3075 = vmatpush1.bf16.msra.mxu0 %v4328_v6  ;;  %v4417_v6 = vld [vmem:[#allocation8 + $0x69c] ss:$52 sps:$4 sm:$0xff]  }
 0x18d   :  { %3157 = vmatpush1.bf16.msra.mxu1 %v4331_v7  ;;  %3076 = vmatprep.subr.bf16.mxu0 %v4336_v8  ;;  %v4412_v7 = vld [vmem:[#allocation8 + $0x690] ss:$52 sps:$4 sm:$0xff]   ;;  %v4415_v8 = vld [vmem:[#allocation8 + $0x698] ss:$52 sps:$4 sm:$0xff]  }
 0x18e   :  { %3158 = vmatprep.subr.bf16.mxu1 %v4339_v9  ;;  %v4420_v9 = vld [vmem:[#allocation8 + $0x6fc] ss:$52 sps:$4 sm:$0xff]  }
 0x190   :  { %3077 = vmatpush1.bf16.msra.mxu0 %v4334_v10  ;;  %v4423_v10 = vld [vmem:[#allocation8 + $0x704] ss:$52 sps:$4 sm:$0xff]  }
 0x191   :  { %3159 = vmatpush1.bf16.msra.mxu1 %v4337_v11  ;;  %3078 = vmatprep.subr.bf16.mxu0 %v4342_v12  ;;  %v4418_v11 = vld [vmem:[#allocation8 + $0x6f8] ss:$52 sps:$4 sm:$0xff]   ;;  %v4421_v12 = vld [vmem:[#allocation8 + $0x700] ss:$52 sps:$4 sm:$0xff]  }
 0x192   :  { %3160 = vmatprep.subr.bf16.mxu1 %v4345_v13  ;;  %v4426_v13 = vld [vmem:[#allocation8 + $0x764] ss:$52 sps:$4 sm:$0xff]  }
 0x194   :  { %3079 = vmatpush1.bf16.msra.mxu0 %v4340_v14  ;;  %v4429_v14 = vld [vmem:[#allocation8 + $0x76c] ss:$52 sps:$4 sm:$0xff]  }
 0x195   :  { %3161 = vmatpush1.bf16.msra.mxu1 %v4343_v15  ;;  %3080 = vmatprep.subr.bf16.mxu0 %v4348_v16  ;;  %v4424_v15 = vld [vmem:[#allocation8 + $0x760] ss:$52 sps:$4 sm:$0xff]   ;;  %v4427_v16 = vld [vmem:[#allocation8 + $0x768] ss:$52 sps:$4 sm:$0xff]  }
 0x196   :  { %3162 = vmatprep.subr.bf16.mxu1 %v4351_v17  ;;  %v4432_v17 = vld [vmem:[#allocation8 + $0x7cc] ss:$52 sps:$4 sm:$0xff]  }
 0x198   :  { %3081 = vmatpush1.bf16.msra.mxu0 %v4346_v18  ;;  %v4435_v18 = vld [vmem:[#allocation8 + $0x7d4] ss:$52 sps:$4 sm:$0xff]  }
 0x199   :  { %3163 = vmatpush1.bf16.msra.mxu1 %v4349_v19  ;;  %3082 = vmatprep.subr.bf16.mxu0 %v4354_v20  ;;  %v4430_v19 = vld [vmem:[#allocation8 + $0x7c8] ss:$52 sps:$4 sm:$0xff]   ;;  %v4433_v20 = vld [vmem:[#allocation8 + $0x7d0] ss:$52 sps:$4 sm:$0xff]  }
 0x19a   :  { %3164 = vmatprep.subr.bf16.mxu1 %v4357_v21  ;;  %v4438_v21 = vld [vmem:[#allocation8 + $0x834] ss:$52 sps:$4 sm:$0xff]  }
 0x19c   :  { %3083 = vmatpush1.bf16.msra.mxu0 %v4352_v22  ;;  %v4441_v22 = vld [vmem:[#allocation8 + $0x83c] ss:$52 sps:$4 sm:$0xff]  }
 0x19d   :  { %3165 = vmatpush1.bf16.msra.mxu1 %v4355_v23  ;;  %3084 = vmatprep.subr.bf16.mxu0 %v4360_v24  ;;  %v4436_v23 = vld [vmem:[#allocation8 + $0x830] ss:$52 sps:$4 sm:$0xff]   ;;  %v4439_v24 = vld [vmem:[#allocation8 + $0x838] ss:$52 sps:$4 sm:$0xff]  }
 0x19e   :  { %3166 = vmatprep.subr.bf16.mxu1 %v4363_v25  ;;  %v4444_v25 = vld [vmem:[#allocation8 + $0x89c] ss:$52 sps:$4 sm:$0xff]  }
 0x1a0   :  { %3085 = vmatpush1.bf16.msra.mxu0 %v4358_v26  ;;  %v4447_v26 = vld [vmem:[#allocation8 + $0x8a4] ss:$52 sps:$4 sm:$0xff]  }
 0x1a1   :  { %3167 = vmatpush1.bf16.msra.mxu1 %v4361_v27  ;;  %3086 = vmatprep.subr.bf16.mxu0 %v4366_v28  ;;  %v4442_v27 = vld [vmem:[#allocation8 + $0x898] ss:$52 sps:$4 sm:$0xff]   ;;  %v4445_v28 = vld [vmem:[#allocation8 + $0x8a0] ss:$52 sps:$4 sm:$0xff]  }
 0x1a2   :  { %3168 = vmatprep.subr.bf16.mxu1 %v4369_v33  ;;  %v4450_v33 = vld [vmem:[#allocation8 + $0x904] ss:$52 sps:$4 sm:$0xff]  }
 0x1a4   :  { %3087 = vmatpush1.bf16.msra.mxu0 %v4364_v35  ;;  %v4453_v35 = vld [vmem:[#allocation8 + $0x90c] ss:$52 sps:$4 sm:$0xff]  }
 0x1a5   :  { %3169 = vmatpush1.bf16.msra.mxu1 %v4367_v36  ;;  %3088 = vmatprep.subr.bf16.mxu0 %v4372_v37  ;;  %v4448_v36 = vld [vmem:[#allocation8 + $0x900] ss:$52 sps:$4 sm:$0xff]   ;;  %v4451_v37 = vld [vmem:[#allocation8 + $0x908] ss:$52 sps:$4 sm:$0xff]  }
 0x1a6   :  { %3170 = vmatprep.subr.bf16.mxu1 %v4375_v38  ;;  %v4456_v38 = vld [vmem:[#allocation8 + $0x96c] ss:$52 sps:$4 sm:$0xff]  }
 0x1a8   :  { %3089 = vmatpush1.bf16.msra.mxu0 %v4370_v40  ;;  %v4459_v40 = vld [vmem:[#allocation8 + $0x974] ss:$52 sps:$4 sm:$0xff]  }
 0x1a9   :  { %3171 = vmatpush1.bf16.msra.mxu1 %v4373_v41  ;;  %3090 = vmatprep.subr.bf16.mxu0 %v4378_v43  ;;  %v4454_v41 = vld [vmem:[#allocation8 + $0x968] ss:$52 sps:$4 sm:$0xff]   ;;  %v4457_v43 = vld [vmem:[#allocation8 + $0x970] ss:$52 sps:$4 sm:$0xff]  }
 0x1aa   :  { %3172 = vmatprep.subr.bf16.mxu1 %v4381_v44  ;;  %v4462_v44 = vld [vmem:[#allocation8 + $0x9d4] ss:$52 sps:$4 sm:$0xff]  }
 0x1ac   :  { %3091 = vmatpush1.bf16.msra.mxu0 %v4376_v45  ;;  %v4465_v45 = vld [vmem:[#allocation8 + $0x9dc] ss:$52 sps:$4 sm:$0xff]  }
 0x1ad   :  { %3173 = vmatpush1.bf16.msra.mxu1 %v4379_v47  ;;  %3092 = vmatprep.subr.bf16.mxu0 %v4384_v48  ;;  %v4460_v47 = vld [vmem:[#allocation8 + $0x9d0] ss:$52 sps:$4 sm:$0xff]   ;;  %v4463_v48 = vld [vmem:[#allocation8 + $0x9d8] ss:$52 sps:$4 sm:$0xff]  }
 0x1ae   :  { %3174 = vmatprep.subr.bf16.mxu1 %v4387_v50  ;;  %v4468_v50 = vld [vmem:[#allocation8 + $0xa3c] ss:$52 sps:$4 sm:$0xff]  }
 0x1b0   :  { %3093 = vmatpush1.bf16.msra.mxu0 %v4382_v51  ;;  %v4471_v51 = vld [vmem:[#allocation8 + $0xa44] ss:$52 sps:$4 sm:$0xff]  }
 0x1b1   :  { %3175 = vmatpush1.bf16.msra.mxu1 %v4385_v52  ;;  %3094 = vmatprep.subr.bf16.mxu0 %v4390_v54  ;;  %v4466_v52 = vld [vmem:[#allocation8 + $0xa38] ss:$52 sps:$4 sm:$0xff]   ;;  %v4469_v54 = vld [vmem:[#allocation8 + $0xa40] ss:$52 sps:$4 sm:$0xff]  }
 0x1b2   :  { %3176 = vmatprep.subr.bf16.mxu1 %v4393_v55  ;;  %v4474_v55 = vld [vmem:[#allocation8 + $0xaa4] ss:$52 sps:$4 sm:$0xff]  }
 0x1b4   :  { %3095 = vmatpush1.bf16.msra.mxu0 %v4388_v56  ;;  %v4477_v56 = vld [vmem:[#allocation8 + $0xaac] ss:$52 sps:$4 sm:$0xff]  }
 0x1b5   :  { %3177 = vmatpush1.bf16.msra.mxu1 %v4391_v57  ;;  %3096 = vmatprep.subr.bf16.mxu0 %v4396_v58  ;;  %v4472_v57 = vld [vmem:[#allocation8 + $0xaa0] ss:$52 sps:$4 sm:$0xff]   ;;  %v4475_v58 = vld [vmem:[#allocation8 + $0xaa8] ss:$52 sps:$4 sm:$0xff]  }
 0x1b6   :  { %3178 = vmatprep.subr.bf16.mxu1 %v4399_v31  ;;  %v4480_v31 = vld [vmem:[#allocation8 + $0xb0c] ss:$52 sps:$4 sm:$0xff]  }
 0x1b8   :  { %3097 = vmatpush1.bf16.msra.mxu0 %v4394_v59  ;;  %v4483_v59 = vld [vmem:[#allocation8 + $0xb14] ss:$52 sps:$4 sm:$0xff]  }
 0x1b9   :  { %3179 = vmatpush1.bf16.msra.mxu1 %v4397_v60  ;;  %3098 = vmatprep.subr.bf16.mxu0 %v4402_v61  ;;  %v4478_v60 = vld [vmem:[#allocation8 + $0xb08] ss:$52 sps:$4 sm:$0xff]   ;;  %v4481_v61 = vld [vmem:[#allocation8 + $0xb10] ss:$52 sps:$4 sm:$0xff]  }
 0x1ba   :  { %3180 = vmatprep.subr.bf16.mxu1 %v4405_v42  ;;  %v4486_v42 = vld [vmem:[#allocation8 + $0xb74] ss:$52 sps:$4 sm:$0xff]  }
 0x1bc   :  { %3099 = vmatpush1.bf16.msra.mxu0 %v4400_v63  ;;  %v4489_v63 = vld [vmem:[#allocation8 + $0xb7c] ss:$52 sps:$4 sm:$0xff]  }
 0x1bd   :  { %3181 = vmatpush1.bf16.msra.mxu1 %v4403_v0  ;;  %3100 = vmatprep.subr.bf16.mxu0 %v4408_v1  ;;  %v4484_v0 = vld [vmem:[#allocation8 + $0xb70] ss:$52 sps:$4 sm:$0xff]   ;;  %v4487_v1 = vld [vmem:[#allocation8 + $0xb78] ss:$52 sps:$4 sm:$0xff]  }
 0x1be   :  { %3182 = vmatprep.subr.bf16.mxu1 %v4411_v2  ;;  %v4492_v2 = vld [vmem:[#allocation8 + $0xbdc] ss:$52 sps:$4 sm:$0xff]  }
 0x1c0   :  { %3101 = vmatpush1.bf16.msra.mxu0 %v4406_v3  ;;  %v4495_v3 = vld [vmem:[#allocation8 + $0xbe4] ss:$52 sps:$4 sm:$0xff]  }
 0x1c1   :  { %3183 = vmatpush1.bf16.msra.mxu1 %v4409_v4  ;;  %3111 = vmatprep.subr.bf16.mxu0 %v4414_v5  ;;  %v4490_v4 = vld [vmem:[#allocation8 + $0xbd8] ss:$52 sps:$4 sm:$0xff]   ;;  %v4493_v5 = vld [vmem:[#allocation8 + $0xbe0] ss:$52 sps:$4 sm:$0xff]  }
 0x1c2   :  { %3193 = vmatprep.subr.bf16.mxu1 %v4417_v6  ;;  %v4498_v6 = vld [vmem:[#allocation8 + $0xc44] ss:$52 sps:$4 sm:$0xff]  }
 0x1c3   :  { %3103 = vmatmul.mubr.bf16.vlgmr.msra.gmra.mrb[8].mxu0 %v5048_v49 }
 0x1c4   :  { %3185 = vmatmul.mubr.bf16.vlgmr.msra.gmra.mrb[8].mxu1 %v5048_v49  ;;  %3112 = vmatpush1.bf16.msra.mxu0 %v4412_v7  ;;  %v4501_v7 = vld [vmem:[#allocation8 + $0xc4c] ss:$52 sps:$4 sm:$0xff]  }
 0x1c5   :  { %3143 = vmatprep.mubr.bf16.mxu0 %v5054_v53  ;;  %3194 = vmatpush1.bf16.msra.mxu1 %v4415_v8  ;;  %v4496_v8 = vld [vmem:[#allocation8 + $0xc40] ss:$52 sps:$4 sm:$0xff]  }
 0x1c6   :  { %3225 = vmatprep.mubr.bf16.mxu1 %v5054_v53  ;;  %3113 = vmatprep.subr.bf16.mxu0 %v4420_v9  ;;  %v4499_v9 = vld [vmem:[#allocation8 + $0xc48] ss:$52 sps:$4 sm:$0xff]  }
 0x1c7   :  { %3195 = vmatprep.subr.bf16.mxu1 %v4423_v10  ;;  %v4504_v10 = vld [vmem:[#allocation8 + $0xcac] ss:$52 sps:$4 sm:$0xff]  }
 0x1c8   :  { %3114 = vmatpush1.bf16.msra.mxu0 %v4418_v11  ;;  %v4507_v11 = vld [vmem:[#allocation8 + $0xcb4] ss:$52 sps:$4 sm:$0xff]  }
 0x1c9   :  { %3196 = vmatpush1.bf16.msra.mxu1 %v4421_v12  ;;  %3115 = vmatprep.subr.bf16.mxu0 %v4426_v13  ;;  %v4502_v12 = vld [vmem:[#allocation8 + $0xca8] ss:$52 sps:$4 sm:$0xff]   ;;  %v4505_v13 = vld [vmem:[#allocation8 + $0xcb0] ss:$52 sps:$4 sm:$0xff]  }
 0x1ca   :  { %3197 = vmatprep.subr.bf16.mxu1 %v4429_v14  ;;  %v4510_v14 = vld [vmem:[#allocation8 + $0x24] ss:$52 sps:$4 sm:$0xff]  }
 0x1cc   :  { %3116 = vmatpush1.bf16.msra.mxu0 %v4424_v15  ;;  %v4513_v15 = vld [vmem:[#allocation8 + $0x2c] ss:$52 sps:$4 sm:$0xff]  }
 0x1cd   :  { %3198 = vmatpush1.bf16.msra.mxu1 %v4427_v16  ;;  %3117 = vmatprep.subr.bf16.mxu0 %v4432_v17  ;;  %v4508_v16 = vld [vmem:[#allocation8 + $0x20] ss:$52 sps:$4 sm:$0xff]   ;;  %v4511_v17 = vld [vmem:[#allocation8 + $0x28] ss:$52 sps:$4 sm:$0xff]  }
 0x1ce   :  { %3199 = vmatprep.subr.bf16.mxu1 %v4435_v18  ;;  %v4516_v18 = vld [vmem:[#allocation8 + $0x8c] ss:$52 sps:$4 sm:$0xff]  }
 0x1d0   :  { %3118 = vmatpush1.bf16.msra.mxu0 %v4430_v19  ;;  %v4519_v19 = vld [vmem:[#allocation8 + $0x94] ss:$52 sps:$4 sm:$0xff]  }
 0x1d1   :  { %3200 = vmatpush1.bf16.msra.mxu1 %v4433_v20  ;;  %3119 = vmatprep.subr.bf16.mxu0 %v4438_v21  ;;  %v4514_v20 = vld [vmem:[#allocation8 + $0x88] ss:$52 sps:$4 sm:$0xff]   ;;  %v4517_v21 = vld [vmem:[#allocation8 + $0x90] ss:$52 sps:$4 sm:$0xff]  }
 0x1d2   :  { %3201 = vmatprep.subr.bf16.mxu1 %v4441_v22  ;;  %v4522_v22 = vld [vmem:[#allocation8 + $0xf4] ss:$52 sps:$4 sm:$0xff]  }
 0x1d4   :  { %3120 = vmatpush1.bf16.msra.mxu0 %v4436_v23  ;;  %v4525_v23 = vld [vmem:[#allocation8 + $0xfc] ss:$52 sps:$4 sm:$0xff]  }
 0x1d5   :  { %3202 = vmatpush1.bf16.msra.mxu1 %v4439_v24  ;;  %3121 = vmatprep.subr.bf16.mxu0 %v4444_v25  ;;  %v4520_v24 = vld [vmem:[#allocation8 + $0xf0] ss:$52 sps:$4 sm:$0xff]   ;;  %v4523_v25 = vld [vmem:[#allocation8 + $0xf8] ss:$52 sps:$4 sm:$0xff]  }
 0x1d6   :  { %3203 = vmatprep.subr.bf16.mxu1 %v4447_v26  ;;  %v4528_v26 = vld [vmem:[#allocation8 + $0x15c] ss:$52 sps:$4 sm:$0xff]  }
 0x1d8   :  { %3122 = vmatpush1.bf16.msra.mxu0 %v4442_v27  ;;  %v4531_v27 = vld [vmem:[#allocation8 + $0x164] ss:$52 sps:$4 sm:$0xff]  }
 0x1d9   :  { %3204 = vmatpush1.bf16.msra.mxu1 %v4445_v28  ;;  %3123 = vmatprep.subr.bf16.mxu0 %v4450_v33  ;;  %v4526_v28 = vld [vmem:[#allocation8 + $0x158] ss:$52 sps:$4 sm:$0xff]   ;;  %v4529_v33 = vld [vmem:[#allocation8 + $0x160] ss:$52 sps:$4 sm:$0xff]  }
 0x1da   :  { %3205 = vmatprep.subr.bf16.mxu1 %v4453_v35  ;;  %v4534_v35 = vld [vmem:[#allocation8 + $0x1c4] ss:$52 sps:$4 sm:$0xff]  }
 0x1dc   :  { %3124 = vmatpush1.bf16.msra.mxu0 %v4448_v36  ;;  %v4537_v36 = vld [vmem:[#allocation8 + $0x1cc] ss:$52 sps:$4 sm:$0xff]  }
 0x1dd   :  { %3206 = vmatpush1.bf16.msra.mxu1 %v4451_v37  ;;  %3125 = vmatprep.subr.bf16.mxu0 %v4456_v38  ;;  %v4532_v37 = vld [vmem:[#allocation8 + $0x1c0] ss:$52 sps:$4 sm:$0xff]   ;;  %v4535_v38 = vld [vmem:[#allocation8 + $0x1c8] ss:$52 sps:$4 sm:$0xff]  }
 0x1de   :  { %3207 = vmatprep.subr.bf16.mxu1 %v4459_v40  ;;  %v4540_v40 = vld [vmem:[#allocation8 + $0x22c] ss:$52 sps:$4 sm:$0xff]  }
 0x1e0   :  { %3126 = vmatpush1.bf16.msra.mxu0 %v4454_v41  ;;  %v4543_v41 = vld [vmem:[#allocation8 + $0x234] ss:$52 sps:$4 sm:$0xff]  }
 0x1e1   :  { %3208 = vmatpush1.bf16.msra.mxu1 %v4457_v43  ;;  %3127 = vmatprep.subr.bf16.mxu0 %v4462_v44  ;;  %v4538_v43 = vld [vmem:[#allocation8 + $0x228] ss:$52 sps:$4 sm:$0xff]   ;;  %v4541_v44 = vld [vmem:[#allocation8 + $0x230] ss:$52 sps:$4 sm:$0xff]  }
 0x1e2   :  { %3209 = vmatprep.subr.bf16.mxu1 %v4465_v45  ;;  %v4546_v45 = vld [vmem:[#allocation8 + $0x294] ss:$52 sps:$4 sm:$0xff]  }
 0x1e4   :  { %3128 = vmatpush1.bf16.msra.mxu0 %v4460_v47  ;;  %v4549_v47 = vld [vmem:[#allocation8 + $0x29c] ss:$52 sps:$4 sm:$0xff]  }
 0x1e5   :  { %3210 = vmatpush1.bf16.msra.mxu1 %v4463_v48  ;;  %3129 = vmatprep.subr.bf16.mxu0 %v4468_v50  ;;  %v4544_v48 = vld [vmem:[#allocation8 + $0x290] ss:$52 sps:$4 sm:$0xff]   ;;  %v4547_v50 = vld [vmem:[#allocation8 + $0x298] ss:$52 sps:$4 sm:$0xff]  }
 0x1e6   :  { %3211 = vmatprep.subr.bf16.mxu1 %v4471_v51  ;;  %v4552_v51 = vld [vmem:[#allocation8 + $0x2fc] ss:$52 sps:$4 sm:$0xff]  }
 0x1e8   :  { %3130 = vmatpush1.bf16.msra.mxu0 %v4466_v52  ;;  %v4555_v52 = vld [vmem:[#allocation8 + $0x304] ss:$52 sps:$4 sm:$0xff]  }
 0x1e9   :  { %3212 = vmatpush1.bf16.msra.mxu1 %v4469_v54  ;;  %3131 = vmatprep.subr.bf16.mxu0 %v4474_v55  ;;  %v4550_v54 = vld [vmem:[#allocation8 + $0x2f8] ss:$52 sps:$4 sm:$0xff]   ;;  %v4553_v55 = vld [vmem:[#allocation8 + $0x300] ss:$52 sps:$4 sm:$0xff]  }
 0x1ea   :  { %3213 = vmatprep.subr.bf16.mxu1 %v4477_v56  ;;  %v4558_v56 = vld [vmem:[#allocation8 + $0x364] ss:$52 sps:$4 sm:$0xff]  }
 0x1ec   :  { %3132 = vmatpush1.bf16.msra.mxu0 %v4472_v57  ;;  %v4561_v57 = vld [vmem:[#allocation8 + $0x36c] ss:$52 sps:$4 sm:$0xff]  }
 0x1ed   :  { %3214 = vmatpush1.bf16.msra.mxu1 %v4475_v58  ;;  %3133 = vmatprep.subr.bf16.mxu0 %v4480_v31  ;;  %v4556_v58 = vld [vmem:[#allocation8 + $0x360] ss:$52 sps:$4 sm:$0xff]   ;;  %v4559_v31 = vld [vmem:[#allocation8 + $0x368] ss:$52 sps:$4 sm:$0xff]  }
 0x1ee   :  { %3215 = vmatprep.subr.bf16.mxu1 %v4483_v59  ;;  %v4564_v59 = vld [vmem:[#allocation8 + $0x3cc] ss:$52 sps:$4 sm:$0xff]  }
 0x1f0   :  { %3134 = vmatpush1.bf16.msra.mxu0 %v4478_v60  ;;  %v4567_v60 = vld [vmem:[#allocation8 + $0x3d4] ss:$52 sps:$4 sm:$0xff]  }
 0x1f1   :  { %3216 = vmatpush1.bf16.msra.mxu1 %v4481_v61  ;;  %3135 = vmatprep.subr.bf16.mxu0 %v4486_v42  ;;  %v4562_v61 = vld [vmem:[#allocation8 + $0x3c8] ss:$52 sps:$4 sm:$0xff]   ;;  %v4565_v42 = vld [vmem:[#allocation8 + $0x3d0] ss:$52 sps:$4 sm:$0xff]  }
 0x1f2   :  { %3217 = vmatprep.subr.bf16.mxu1 %v4489_v63  ;;  %v4570_v63 = vld [vmem:[#allocation8 + $0x434] ss:$52 sps:$4 sm:$0xff]  }
 0x1f4   :  { %3136 = vmatpush1.bf16.msra.mxu0 %v4484_v0  ;;  %v4573_v0 = vld [vmem:[#allocation8 + $0x43c] ss:$52 sps:$4 sm:$0xff]  }
 0x1f5   :  { %3218 = vmatpush1.bf16.msra.mxu1 %v4487_v1  ;;  %3137 = vmatprep.subr.bf16.mxu0 %v4492_v2  ;;  %v4568_v1 = vld [vmem:[#allocation8 + $0x430] ss:$52 sps:$4 sm:$0xff]   ;;  %v4571_v2 = vld [vmem:[#allocation8 + $0x438] ss:$52 sps:$4 sm:$0xff]  }
 0x1f6   :  { %3219 = vmatprep.subr.bf16.mxu1 %v4495_v3  ;;  %v4576_v3 = vld [vmem:[#allocation8 + $0x49c] ss:$52 sps:$4 sm:$0xff]  }
 0x1f8   :  { %3138 = vmatpush1.bf16.msra.mxu0 %v4490_v4  ;;  %v4579_v4 = vld [vmem:[#allocation8 + $0x4a4] ss:$52 sps:$4 sm:$0xff]  }
 0x1f9   :  { %3220 = vmatpush1.bf16.msra.mxu1 %v4493_v5  ;;  %3139 = vmatprep.subr.bf16.mxu0 %v4498_v6  ;;  %v4574_v5 = vld [vmem:[#allocation8 + $0x498] ss:$52 sps:$4 sm:$0xff]   ;;  %v4577_v6 = vld [vmem:[#allocation8 + $0x4a0] ss:$52 sps:$4 sm:$0xff]  }
 0x1fa   :  { %3221 = vmatprep.subr.bf16.mxu1 %v4501_v7  ;;  %v4582_v7 = vld [vmem:[#allocation8 + $0x504] ss:$52 sps:$4 sm:$0xff]  }
 0x1fc   :  { %3140 = vmatpush1.bf16.msra.mxu0 %v4496_v8  ;;  %v4585_v8 = vld [vmem:[#allocation8 + $0x50c] ss:$52 sps:$4 sm:$0xff]  }
 0x1fd   :  { %3222 = vmatpush1.bf16.msra.mxu1 %v4499_v9  ;;  %3141 = vmatprep.subr.bf16.mxu0 %v4504_v10  ;;  %v4580_v9 = vld [vmem:[#allocation8 + $0x500] ss:$52 sps:$4 sm:$0xff]   ;;  %v4583_v10 = vld [vmem:[#allocation8 + $0x508] ss:$52 sps:$4 sm:$0xff]  }
 0x1fe   :  { %3223 = vmatprep.subr.bf16.mxu1 %v4507_v11  ;;  %v4588_v11 = vld [vmem:[#allocation8 + $0x56c] ss:$52 sps:$4 sm:$0xff]  }
 0x200   :  { %3142 = vmatpush1.bf16.msra.mxu0 %v4502_v12  ;;  %v4591_v12 = vld [vmem:[#allocation8 + $0x574] ss:$52 sps:$4 sm:$0xff]  }
 0x201   :  { %3224 = vmatpush1.bf16.msra.mxu1 %v4505_v13  ;;  %3234 = vmatprep.subr.bf16.mxu0 %v4510_v14  ;;  %v4586_v13 = vld [vmem:[#allocation8 + $0x568] ss:$52 sps:$4 sm:$0xff]   ;;  %v4589_v14 = vld [vmem:[#allocation8 + $0x570] ss:$52 sps:$4 sm:$0xff]  }
 0x202   :  { %3316 = vmatprep.subr.bf16.mxu1 %v4513_v15  ;;  %v4594_v15 = vld [vmem:[#allocation8 + $0x5d4] ss:$52 sps:$4 sm:$0xff]  }
 0x203   :  { %3144 = vmatmul.mubr.bf16.vlgmr.msra.gmra.mrb[8].mxu0 %v5064_v62 }
 0x204   :  { %3226 = vmatmul.mubr.bf16.vlgmr.msra.gmra.mrb[8].mxu1 %v5064_v62  ;;  %3235 = vmatpush1.bf16.msra.mxu0 %v4508_v16  ;;  %v4597_v16 = vld [vmem:[#allocation8 + $0x5dc] ss:$52 sps:$4 sm:$0xff]  }
 0x205   :  { %3266 = vmatprep.mubr.bf16.mxu0 %v5046_v46  ;;  %3317 = vmatpush1.bf16.msra.mxu1 %v4511_v17  ;;  %v4592_v17 = vld [vmem:[#allocation8 + $0x5d0] ss:$52 sps:$4 sm:$0xff]  }
 0x206   :  { %3348 = vmatprep.mubr.bf16.mxu1 %v5046_v46  ;;  %3236 = vmatprep.subr.bf16.mxu0 %v4516_v18  ;;  %v4595_v18 = vld [vmem:[#allocation8 + $0x5d8] ss:$52 sps:$4 sm:$0xff]  }
 0x207   :  { %3318 = vmatprep.subr.bf16.mxu1 %v4519_v19  ;;  %v4600_v19 = vld [vmem:[#allocation8 + $0x63c] ss:$52 sps:$4 sm:$0xff]  }
 0x208   :  { %3237 = vmatpush1.bf16.msra.mxu0 %v4514_v20  ;;  %v4603_v20 = vld [vmem:[#allocation8 + $0x644] ss:$52 sps:$4 sm:$0xff]  }
 0x209   :  { %3319 = vmatpush1.bf16.msra.mxu1 %v4517_v21  ;;  %3238 = vmatprep.subr.bf16.mxu0 %v4522_v22  ;;  %v4598_v21 = vld [vmem:[#allocation8 + $0x638] ss:$52 sps:$4 sm:$0xff]   ;;  %v4601_v22 = vld [vmem:[#allocation8 + $0x640] ss:$52 sps:$4 sm:$0xff]  }
 0x20a   :  { %3320 = vmatprep.subr.bf16.mxu1 %v4525_v23  ;;  %v4606_v23 = vld [vmem:[#allocation8 + $0x6a4] ss:$52 sps:$4 sm:$0xff]  }
 0x20c   :  { %3239 = vmatpush1.bf16.msra.mxu0 %v4520_v24  ;;  %v4609_v24 = vld [vmem:[#allocation8 + $0x6ac] ss:$52 sps:$4 sm:$0xff]  }
 0x20d   :  { %3321 = vmatpush1.bf16.msra.mxu1 %v4523_v25  ;;  %3240 = vmatprep.subr.bf16.mxu0 %v4528_v26  ;;  %v4604_v25 = vld [vmem:[#allocation8 + $0x6a0] ss:$52 sps:$4 sm:$0xff]   ;;  %v4607_v26 = vld [vmem:[#allocation8 + $0x6a8] ss:$52 sps:$4 sm:$0xff]  }
 0x20e   :  { %3322 = vmatprep.subr.bf16.mxu1 %v4531_v27  ;;  %v4612_v27 = vld [vmem:[#allocation8 + $0x70c] ss:$52 sps:$4 sm:$0xff]  }
 0x210   :  { %3241 = vmatpush1.bf16.msra.mxu0 %v4526_v28  ;;  %v4615_v28 = vld [vmem:[#allocation8 + $0x714] ss:$52 sps:$4 sm:$0xff]  }
 0x211   :  { %3323 = vmatpush1.bf16.msra.mxu1 %v4529_v33  ;;  %3242 = vmatprep.subr.bf16.mxu0 %v4534_v35  ;;  %v4610_v33 = vld [vmem:[#allocation8 + $0x708] ss:$52 sps:$4 sm:$0xff]   ;;  %v4613_v35 = vld [vmem:[#allocation8 + $0x710] ss:$52 sps:$4 sm:$0xff]  }
 0x212   :  { %3324 = vmatprep.subr.bf16.mxu1 %v4537_v36  ;;  %v4618_v36 = vld [vmem:[#allocation8 + $0x774] ss:$52 sps:$4 sm:$0xff]  }
 0x214   :  { %3243 = vmatpush1.bf16.msra.mxu0 %v4532_v37  ;;  %v4621_v37 = vld [vmem:[#allocation8 + $0x77c] ss:$52 sps:$4 sm:$0xff]  }
 0x215   :  { %3325 = vmatpush1.bf16.msra.mxu1 %v4535_v38  ;;  %3244 = vmatprep.subr.bf16.mxu0 %v4540_v40  ;;  %v4616_v38 = vld [vmem:[#allocation8 + $0x770] ss:$52 sps:$4 sm:$0xff]   ;;  %v4619_v40 = vld [vmem:[#allocation8 + $0x778] ss:$52 sps:$4 sm:$0xff]  }
 0x216   :  { %3326 = vmatprep.subr.bf16.mxu1 %v4543_v41  ;;  %v4624_v41 = vld [vmem:[#allocation8 + $0x7dc] ss:$52 sps:$4 sm:$0xff]  }
 0x218   :  { %3245 = vmatpush1.bf16.msra.mxu0 %v4538_v43  ;;  %v4627_v43 = vld [vmem:[#allocation8 + $0x7e4] ss:$52 sps:$4 sm:$0xff]  }
 0x219   :  { %3327 = vmatpush1.bf16.msra.mxu1 %v4541_v44  ;;  %3246 = vmatprep.subr.bf16.mxu0 %v4546_v45  ;;  %v4622_v44 = vld [vmem:[#allocation8 + $0x7d8] ss:$52 sps:$4 sm:$0xff]   ;;  %v4625_v45 = vld [vmem:[#allocation8 + $0x7e0] ss:$52 sps:$4 sm:$0xff]  }
 0x21a   :  { %3328 = vmatprep.subr.bf16.mxu1 %v4549_v47  ;;  %v4630_v47 = vld [vmem:[#allocation8 + $0x844] ss:$52 sps:$4 sm:$0xff]  }
 0x21c   :  { %3247 = vmatpush1.bf16.msra.mxu0 %v4544_v48  ;;  %v4633_v48 = vld [vmem:[#allocation8 + $0x84c] ss:$52 sps:$4 sm:$0xff]  }
 0x21d   :  { %3329 = vmatpush1.bf16.msra.mxu1 %v4547_v50  ;;  %3248 = vmatprep.subr.bf16.mxu0 %v4552_v51  ;;  %v4628_v50 = vld [vmem:[#allocation8 + $0x840] ss:$52 sps:$4 sm:$0xff]  }
 0x21e   :  { %3330 = vmatprep.subr.bf16.mxu1 %v4555_v52  ;;  %v5082_v51 = vld [vmem:[#allocation10] sm:$0xff]  ;;  %v4631_v52 = vld [vmem:[#allocation8 + $0x848] ss:$52 sps:$4 sm:$0xff]  }
 0x220   :  { %3249 = vmatpush1.bf16.msra.mxu0 %v4550_v54  ;;  %v4636_v54 = vld [vmem:[#allocation8 + $0x8ac] ss:$52 sps:$4 sm:$0xff]  }
 0x221   :  { %3331 = vmatpush1.bf16.msra.mxu1 %v4553_v55  ;;  %3250 = vmatprep.subr.bf16.mxu0 %v4558_v56  ;;  %v4639_v55 = vld [vmem:[#allocation8 + $0x8b4] ss:$52 sps:$4 sm:$0xff]   ;;  %v732_v56 = vrot.slane %v5082_v51, %v5028_v30 }
 0x222   :  { %3332 = vmatprep.subr.bf16.mxu1 %v4561_v57  ;;  %v740_v57 = vrot.slane %v5082_v51, %v5059_v39 }
 0x224   :  { %3251 = vmatpush1.bf16.msra.mxu0 %v4556_v58  ;;  %v736_v58 = vrot.slane %v5082_v51, %v5033_v32 }
 0x225   :  { %3333 = vmatpush1.bf16.msra.mxu1 %v4559_v31  ;;  %3252 = vmatprep.subr.bf16.mxu0 %v4564_v59  ;;  %v744_v31 = vrot.slane %v5082_v51, %v5038_v34  ;;  %v4634_v59 = vld [vmem:[#allocation8 + $0x8a8] ss:$52 sps:$4 sm:$0xff]  }
 0x226   :  { %3334 = vmatprep.subr.bf16.mxu1 %v4567_v60  ;;  %v4637_v60 = vld [vmem:[#allocation8 + $0x8b0] ss:$52 sps:$4 sm:$0xff]  }
 0x228   :  { %3253 = vmatpush1.bf16.msra.mxu0 %v4562_v61  ;;  %v4642_v61 = vld [vmem:[#allocation8 + $0x914] ss:$52 sps:$4 sm:$0xff]  }
 0x229   :  { %3335 = vmatpush1.bf16.msra.mxu1 %v4565_v42  ;;  %3254 = vmatprep.subr.bf16.mxu0 %v4570_v63 }
 0x22a   :  { %3336 = vmatprep.subr.bf16.mxu1 %v4573_v0  ;;  %v4645_v0 = vld [vmem:[#allocation8 + $0x91c] ss:$52 sps:$4 sm:$0xff]  }
 0x22c   :  { %3255 = vmatpush1.bf16.msra.mxu0 %v4568_v1 }
 0x22d   :  { %3337 = vmatpush1.bf16.msra.mxu1 %v4571_v2  ;;  %3256 = vmatprep.subr.bf16.mxu0 %v4576_v3 }
 0x22e   :  { %3338 = vmatprep.subr.bf16.mxu1 %v4579_v4 }
 0x230   :  { %3257 = vmatpush1.bf16.msra.mxu0 %v4574_v5  ;;  %v4640_v5 = vld [vmem:[#allocation8 + $0x910] ss:$52 sps:$4 sm:$0xff]  }
 0x231   :  { %3339 = vmatpush1.bf16.msra.mxu1 %v4577_v6  ;;  %3258 = vmatprep.subr.bf16.mxu0 %v4582_v7 }
 0x232   :  { %3340 = vmatprep.subr.bf16.mxu1 %v4585_v8 }
 0x234   :  { %3259 = vmatpush1.bf16.msra.mxu0 %v4580_v9 }
 0x235   :  { %3341 = vmatpush1.bf16.msra.mxu1 %v4583_v10  ;;  %3260 = vmatprep.subr.bf16.mxu0 %v4588_v11  ;;  %v4643_v10 = vld [vmem:[#allocation8 + $0x918] ss:$52 sps:$4 sm:$0xff]   ;;  %v4648_v11 = vld [vmem:[#allocation8 + $0x97c] ss:$52 sps:$4 sm:$0xff]  }
 0x236   :  { %3342 = vmatprep.subr.bf16.mxu1 %v4591_v12 }
 0x238   :  { %3261 = vmatpush1.bf16.msra.mxu0 %v4586_v13 }
 0x239   :  { %3343 = vmatpush1.bf16.msra.mxu1 %v4589_v14  ;;  %3262 = vmatprep.subr.bf16.mxu0 %v4594_v15 }
 0x23a   :  { %3344 = vmatprep.subr.bf16.mxu1 %v4597_v16 }
 0x23c   :  { %3263 = vmatpush1.bf16.msra.mxu0 %v4592_v17 }
 0x23d   :  { %3345 = vmatpush1.bf16.msra.mxu1 %v4595_v18  ;;  %3264 = vmatprep.subr.bf16.mxu0 %v4600_v19  ;;  %v4651_v18 = vld [vmem:[#allocation8 + $0x984] ss:$52 sps:$4 sm:$0xff]  }
 0x23e   :  { %3346 = vmatprep.subr.bf16.mxu1 %v4603_v20  ;;  %v4646_v19 = vld [vmem:[#allocation8 + $0x978] ss:$52 sps:$4 sm:$0xff]   ;;  %v4649_v20 = vld [vmem:[#allocation8 + $0x980] ss:$52 sps:$4 sm:$0xff]  }
 0x240   :  { %3265 = vmatpush1.bf16.msra.mxu0 %v4598_v21  ;;  %v4654_v21 = vld [vmem:[#allocation8 + $0x9e4] ss:$52 sps:$4 sm:$0xff]  }
 0x241   :  { %3347 = vmatpush1.bf16.msra.mxu1 %v4601_v22  ;;  %3275 = vmatprep.subr.bf16.mxu0 %v4606_v23  ;;  %v4657_v22 = vld [vmem:[#allocation8 + $0x9ec] ss:$52 sps:$4 sm:$0xff]  }
 0x242   :  { %3357 = vmatprep.subr.bf16.mxu1 %v4609_v24  ;;  %v4652_v23 = vld [vmem:[#allocation8 + $0x9e0] ss:$52 sps:$4 sm:$0xff]   ;;  %v4655_v24 = vld [vmem:[#allocation8 + $0x9e8] ss:$52 sps:$4 sm:$0xff]  }
 0x243   :  { %3267 = vmatmul.mubr.bf16.vlgmr.msra.gmra.mrb[12].mxu0 %v5048_v49 }
 0x244   :  { %3349 = vmatmul.mubr.bf16.vlgmr.msra.gmra.mrb[12].mxu1 %v5048_v49  ;;  %3276 = vmatpush1.bf16.msra.mxu0 %v4604_v25  ;;  %v4660_v25 = vld [vmem:[#allocation8 + $0xa4c] ss:$52 sps:$4 sm:$0xff]  }
 0x245   :  { %3307 = vmatprep.mubr.bf16.mxu0 %v5054_v53  ;;  %3358 = vmatpush1.bf16.msra.mxu1 %v4607_v26  ;;  %v4663_v26 = vld [vmem:[#allocation8 + $0xa54] ss:$52 sps:$4 sm:$0xff]  }
 0x246   :  { %3389 = vmatprep.mubr.bf16.mxu1 %v5054_v53  ;;  %3277 = vmatprep.subr.bf16.mxu0 %v4612_v27  ;;  %v4658_v27 = vld [vmem:[#allocation8 + $0xa48] ss:$52 sps:$4 sm:$0xff]  }
 0x247   :  { %3359 = vmatprep.subr.bf16.mxu1 %v4615_v28 }
 0x248   :  { %3278 = vmatpush1.bf16.msra.mxu0 %v4610_v33  ;;  %v4661_v33 = vld [vmem:[#allocation8 + $0xa50] ss:$52 sps:$4 sm:$0xff]  }
 0x249   :  { %3360 = vmatpush1.bf16.msra.mxu1 %v4613_v35  ;;  %3279 = vmatprep.subr.bf16.mxu0 %v4618_v36  ;;  %v4666_v35 = vld [vmem:[#allocation8 + $0xab4] ss:$52 sps:$4 sm:$0xff]  }
 0x24a   :  { %3361 = vmatprep.subr.bf16.mxu1 %v4621_v37 }
 0x24c   :  { %3280 = vmatpush1.bf16.msra.mxu0 %v4616_v38  ;;  %v4669_v38 = vld [vmem:[#allocation8 + $0xabc] ss:$52 sps:$4 sm:$0xff]  }
 0x24d   :  { %3362 = vmatpush1.bf16.msra.mxu1 %v4619_v40  ;;  %3281 = vmatprep.subr.bf16.mxu0 %v4624_v41 }
 0x24e   :  { %3363 = vmatprep.subr.bf16.mxu1 %v4627_v43 }
 0x250   :  { %3282 = vmatpush1.bf16.msra.mxu0 %v4622_v44 }
 0x251   :  { %3364 = vmatpush1.bf16.msra.mxu1 %v4625_v45  ;;  %3283 = vmatprep.subr.bf16.mxu0 %v4630_v47  ;;  %v4664_v45 = vld [vmem:[#allocation8 + $0xab0] ss:$52 sps:$4 sm:$0xff]  }
 0x252   :  { %3365 = vmatprep.subr.bf16.mxu1 %v4633_v48  ;;  %v4667_v48 = vld [vmem:[#allocation8 + $0xab8] ss:$52 sps:$4 sm:$0xff]  }
 0x254   :  { %3284 = vmatpush1.bf16.msra.mxu0 %v4628_v50  ;;  %v4672_v50 = vld [vmem:[#allocation8 + $0xb1c] ss:$52 sps:$4 sm:$0xff]  }
 0x255   :  { %3366 = vmatpush1.bf16.msra.mxu1 %v4631_v52  ;;  %3285 = vmatprep.subr.bf16.mxu0 %v4636_v54  ;;  %v4675_v52 = vld [vmem:[#allocation8 + $0xb24] ss:$52 sps:$4 sm:$0xff]  }
 0x256   :  { %v2981_v42 = vpop.f32.mrb[4].mxu0  ;;  %v3063_v63 = vpop.f32.mrb[4].mxu1  ;;  %3367 = vmatprep.subr.bf16.mxu1 %v4639_v55  ;;  %v4670_v54 = vld [vmem:[#allocation8 + $0xb18] ss:$52 sps:$4 sm:$0xff]   ;;  %v4673_v55 = vld [vmem:[#allocation8 + $0xb20] ss:$52 sps:$4 sm:$0xff]  }
 0x257   :  { %v4077_v1 = vadd.f32 %v2981_v42, %v732_v56  ;;  %v4079_v2 = vadd.f32 %v3063_v63, %v740_v57  ;;  %v2983_v3 = vpop.f32.mrb[5].mxu0  ;;  %v3065_v4 = vpop.f32.mrb[5].mxu1  ;;  %v4678_v56 = vld [vmem:[#allocation8 + $0xb84] ss:$52 sps:$4 sm:$0xff]   ;;  %v4681_v57 = vld [vmem:[#allocation8 + $0xb8c] ss:$52 sps:$4 sm:$0xff]  }
 0x258   :  { %v4078_v6 = vadd.f32 %v2983_v3, %v736_v58  ;;  %v4080_v7 = vadd.f32 %v3065_v4, %v744_v31  ;;  %v2985_v8 = vpop.f32.mrb[6].mxu0  ;;  %v3067_v9 = vpop.f32.mrb[6].mxu1  ;;  %3286 = vmatpush1.bf16.msra.mxu0 %v4634_v59  ;;  %v4676_v58 = vld [vmem:[#allocation8 + $0xb80] ss:$52 sps:$4 sm:$0xff]   ;;  %v4679_v31 = vld [vmem:[#allocation8 + $0xb88] ss:$52 sps:$4 sm:$0xff]  }
 0x259   :  { %v4004_v12 = vmul.f32 -1.442695, %v4077_v1  ;;  %v4006_v13 = vmul.f32 -1.442695, %v4079_v2  ;;  %3368 = vmatpush1.bf16.msra.mxu1 %v4637_v60  ;;  %v2986_v14 = vpop.f32.mrb[7].mxu0  ;;  %v3068_v15 = vpop.f32.mrb[7].mxu1  ;;  %3287 = vmatprep.subr.bf16.mxu0 %v4642_v61 }
 0x25a   :  { %v4005_v16 = vmul.f32 -1.442695, %v4078_v6  ;;  %v4007_v17 = vmul.f32 -1.442695, %v4080_v7  ;;  %3369 = vmatprep.subr.bf16.mxu1 %v4645_v0  ;;  %v4684_v59 = vld [vmem:[#allocation8 + $0xbec] ss:$52 sps:$4 sm:$0xff]  }
 0x25b   :  { %4732 = vpow2.f32 %v4004_v12  ;;  %v4687_v61 = vld [vmem:[#allocation8 + $0xbf4] ss:$52 sps:$4 sm:$0xff]   ;;  %v4685_v2 = vld [vmem:[#allocation8 + $0xbf0] ss:$52 sps:$4 sm:$0xff]   ;;  %v4691_v6 = vld [vmem:[#allocation8 + $0xc58] ss:$52 sps:$4 sm:$0xff]  }
 0x25c   :  { %4734 = vpow2.f32 %v4006_v13  ;;  %3288 = vmatpush1.bf16.msra.mxu0 %v4640_v5  ;;  %v4682_v0 = vld [vmem:[#allocation8 + $0xbe8] ss:$52 sps:$4 sm:$0xff]   ;;  %v4688_v5 = vld [vmem:[#allocation8 + $0xc50] ss:$52 sps:$4 sm:$0xff]   ;;  %v4694_v9 = vld [vmem:[#allocation8 + $0xcb8] ss:$52 sps:$4 sm:$0xff]  }
 0x25d   :  { %4736 = vpow2.f32 %v4005_v16  ;;  %3370 = vmatpush1.bf16.msra.mxu1 %v4643_v10  ;;  %3289 = vmatprep.subr.bf16.mxu0 %v4648_v11  ;;  %v4690_v3 = vld [vmem:[#allocation8 + $0xc54] ss:$52 sps:$4 sm:$0xff]   ;;  %v4693_v4 = vld [vmem:[#allocation8 + $0xc5c] ss:$52 sps:$4 sm:$0xff]   ;;  %v4699_v8 = vld [vmem:[#allocation8 + $0xcc4] ss:$52 sps:$4 sm:$0xff]  }
 0x25e   :  { %4738 = vpow2.f32 %v4007_v17  ;;  %3371 = vmatprep.subr.bf16.mxu1 %v4651_v18  ;;  %v4696_v7 = vld [vmem:[#allocation8 + $0xcbc] ss:$52 sps:$4 sm:$0xff]   ;;  %v4697_v10 = vld [vmem:[#allocation8 + $0xcc0] ss:$52 sps:$4 sm:$0xff]   ;;  %v4704_v15 = vld [vmem:[#allocation8 + $0x3d8] ss:$52 sps:$4 sm:$0xff]  }
 0x25f   :  { %v4700_v11 = vld [vmem:[#allocation8 + $0x370] ss:$52 sps:$4 sm:$0xff]   ;;  %v4705_v16 = vld [vmem:[#allocation8 + $0xa58] ss:$52 sps:$4 sm:$0xff]  }
 0x260   :  { %3290 = vmatpush1.bf16.msra.mxu0 %v4646_v19  ;;  %v4701_v12 = vld [vmem:[#allocation8 + $0x9f0] ss:$52 sps:$4 sm:$0xff]   ;;  %v4706_v17 = vld [vmem:[#allocation8 + $0x98] ss:$52 sps:$4 sm:$0xff]   ;;  %v4708_v19 = vld [vmem:[#allocation8 + $0x440] ss:$52 sps:$4 sm:$0xff]  }
 0x261   :  { %3372 = vmatpush1.bf16.msra.mxu1 %v4649_v20  ;;  %3291 = vmatprep.subr.bf16.mxu0 %v4654_v21  ;;  %v4702_v13 = vld [vmem:[#allocation8 + $0x30] ss:$52 sps:$4 sm:$0xff]   ;;  %v4707_v18 = vld [vmem:[#allocation8 + $0x718] ss:$52 sps:$4 sm:$0xff]   ;;  %v4709_v20 = vld [vmem:[#allocation8 + $0xac0] ss:$52 sps:$4 sm:$0xff]  }
 0x262   :  { %3373 = vmatprep.subr.bf16.mxu1 %v4657_v22  ;;  %v4703_v14 = vld [vmem:[#allocation8 + $0x6b0] ss:$52 sps:$4 sm:$0xff]   ;;  %v4710_v21 = vld [vmem:[#allocation8 + $0x100] ss:$52 sps:$4 sm:$0xff]  }
 0x263   :  { %v4711_v22 = vld [vmem:[#allocation8 + $0x780] ss:$52 sps:$4 sm:$0xff]  }
 0x264   :  { %3292 = vmatpush1.bf16.msra.mxu0 %v4652_v23  ;;  %v4712_v23 = vld [vmem:[#allocation8 + $0x4a8] ss:$52 sps:$4 sm:$0xff]  }
 0x265   :  { %v4733_v28 = vpop.eup %4732  ;;  %3374 = vmatpush1.bf16.msra.mxu1 %v4655_v24  ;;  %3293 = vmatprep.subr.bf16.mxu0 %v4660_v25  ;;  %v4713_v24 = vld [vmem:[#allocation8 + $0xb28] ss:$52 sps:$4 sm:$0xff]  }
 0x266   :  { %v4735_v36 = vpop.eup %4734  ;;  %v3517_v37 = vadd.f32 1.0, %v4733_v28  ;;  %3375 = vmatprep.subr.bf16.mxu1 %v4663_v26  ;;  %v4714_v25 = vld [vmem:[#allocation8 + $0x168] ss:$52 sps:$4 sm:$0xff]   ;;  %v4716_v26 = vld [vmem:[#allocation8 + $0x510] ss:$52 sps:$4 sm:$0xff]  }
 0x267   :  { %v4737_v40 = vpop.eup %4736  ;;  %v3519_v41 = vadd.f32 1.0, %v4735_v36  ;;  %v4719_v28 = vld [vmem:[#allocation8 + $0x850] ss:$52 sps:$4 sm:$0xff]   ;;  %v4722_v36 = vld [vmem:[#allocation8 + $0x238] ss:$52 sps:$4 sm:$0xff]  }
 0x268   :  { %v4739_v43 = vpop.eup %4738  ;;  %4740 = vrcp.f32 %v3517_v37  ;;  %v3518_v44 = vadd.f32 1.0, %v4737_v40  ;;  %3294 = vmatpush1.bf16.msra.mxu0 %v4658_v27  ;;  %v4717_v27 = vld [vmem:[#allocation8 + $0xb90] ss:$52 sps:$4 sm:$0xff]   ;;  %v4723_v37 = vld [vmem:[#allocation8 + $0x8b8] ss:$52 sps:$4 sm:$0xff]  }
 0x269   :  { %4742 = vrcp.f32 %v3519_v41  ;;  %v3520_v47 = vadd.f32 1.0, %v4739_v43  ;;  %3376 = vmatpush1.bf16.msra.mxu1 %v4661_v33  ;;  %3295 = vmatprep.subr.bf16.mxu0 %v4666_v35  ;;  %v4720_v33 = vld [vmem:[#allocation8 + $0x578] ss:$52 sps:$4 sm:$0xff]   ;;  %v4725_v40 = vld [vmem:[#allocation8 + $0xc60] ss:$52 sps:$4 sm:$0xff]  }
 0x26a   :  { %4744 = vrcp.f32 %v3518_v44  ;;  %3377 = vmatprep.subr.bf16.mxu1 %v4669_v38  ;;  %v4721_v35 = vld [vmem:[#allocation8 + $0xbf8] ss:$52 sps:$4 sm:$0xff]   ;;  %v4724_v38 = vld [vmem:[#allocation8 + $0x5e0] ss:$52 sps:$4 sm:$0xff]   ;;  %v4728_v44 = vld [vmem:[#allocation8 + $0x648] ss:$52 sps:$4 sm:$0xff]  }
 0x26b   :  { %4746 = vrcp.f32 %v3520_v47  ;;  %v4726_v41 = vld [vmem:[#allocation8 + $0x2a0] ss:$52 sps:$4 sm:$0xff]   ;;  %v4730_v47 = vld [vmem:[#allocation8 + $0x308] ss:$52 sps:$4 sm:$0xff]  }
 0x26c   :  { %3296 = vmatpush1.bf16.msra.mxu0 %v4664_v45  ;;  %v4727_v43 = vld [vmem:[#allocation8 + $0x920] ss:$52 sps:$4 sm:$0xff]   ;;  %v4729_v45 = vld [vmem:[#allocation8 + $0xcc8] ss:$52 sps:$4 sm:$0xff]  }
 0x26d   :  { %3378 = vmatpush1.bf16.msra.mxu1 %v4667_v48  ;;  %3297 = vmatprep.subr.bf16.mxu0 %v4672_v50  ;;  %v4731_v48 = vld [vmem:[#allocation8 + $0x988] ss:$52 sps:$4 sm:$0xff]   ;;  %v747_v50 = vsub.s32 4, %v5025_v29 }
 0x26e   :  { %3379 = vmatprep.subr.bf16.mxu1 %v4675_v52  ;;  %v755_v52 = vsub.s32 6, %v5025_v29 }
 0x270   :  { %3298 = vmatpush1.bf16.msra.mxu0 %v4670_v54  ;;  %v751_v54 = vsub.s32 5, %v5025_v29 }
 0x271   :  { %3380 = vmatpush1.bf16.msra.mxu1 %v4673_v55  ;;  %3299 = vmatprep.subr.bf16.mxu0 %v4678_v56  ;;  %v759_v55 = vsub.s32 7, %v5025_v29  ;;  %v748_v56 = vrot.slane %v5082_v51, %v747_v50 }
 0x272   :  { %v4741_v60 = vpop.eup %4740  ;;  %3381 = vmatprep.subr.bf16.mxu1 %v4681_v57  ;;  %v756_v57 = vrot.slane %v5082_v51, %v755_v52 }
 0x273   :  { %v4743_v42 = vpop.eup %4742  ;;  %3556 = vst [vmem:[#allocation11] sm:$0xff] %v4741_v60 }
 0x274   :  { %v4745_v63 = vpop.eup %4744  ;;  %3558 = vst [vmem:[#allocation11 + $0x10] sm:$0xff] %v4743_v42  ;;  %3300 = vmatpush1.bf16.msra.mxu0 %v4676_v58  ;;  %v752_v58 = vrot.slane %v5082_v51, %v751_v54 }
 0x275   :  { %v4747_v1 = vpop.eup %4746  ;;  %3557 = vst [vmem:[#allocation11 + $0x8] sm:$0xff] %v4745_v63  ;;  %3382 = vmatpush1.bf16.msra.mxu1 %v4679_v31  ;;  %3301 = vmatprep.subr.bf16.mxu0 %v4684_v59 }
 0x276   :  { %3559 = vst [vmem:[#allocation11 + $0x18] sm:$0xff] %v4747_v1  ;;  %3383 = vmatprep.subr.bf16.mxu1 %v4687_v61 }
 0x278   :  { %3302 = vmatpush1.bf16.msra.mxu0 %v4682_v0 }
 0x279   :  { %3384 = vmatpush1.bf16.msra.mxu1 %v4685_v2  ;;  %3303 = vmatprep.subr.bf16.mxu0 %v4690_v3 }
 0x27a   :  { %3385 = vmatprep.subr.bf16.mxu1 %v4693_v4 }
 0x27c   :  { %3304 = vmatpush1.bf16.msra.mxu0 %v4688_v5 }
 0x27d   :  { %3386 = vmatpush1.bf16.msra.mxu1 %v4691_v6  ;;  %3305 = vmatprep.subr.bf16.mxu0 %v4696_v7 }
 0x27e   :  { %3387 = vmatprep.subr.bf16.mxu1 %v4699_v8 }
 0x280   :  { %3306 = vmatpush1.bf16.msra.mxu0 %v4694_v9 }
 0x281   :  { %3388 = vmatpush1.bf16.msra.mxu1 %v4697_v10  ;;  %4017 = vmatprep.subr.bf16.mxu0 %v4700_v11 }
 0x282   :  { %4039 = vmatprep.subr.bf16.mxu1 %v4701_v12 }
 0x283   :  { %3308 = vmatmul.mubr.bf16.vlgmr.msra.gmra.mrb[12].mxu0 %v5064_v62 }
 0x284   :  { %3390 = vmatmul.mubr.bf16.vlgmr.msra.gmra.mrb[12].mxu1 %v5064_v62  ;;  %4018 = vmatpush3.bf16.msra.mxu0 %v4702_v13 }
 0x285   :  { %3430 = vmatprep.mubr.bf16.mxu0 %v5046_v46  ;;  %4040 = vmatpush3.bf16.msra.mxu1 %v4703_v14  ;;  %v4715_v46 = vld [vmem:[#allocation8 + $0x7e8] ss:$52 sps:$4 sm:$0xff]  }
 0x286   :  { %3470 = vmatprep.mubr.bf16.mxu1 %v5054_v53  ;;  %4019 = vmatprep.subr.bf16.mxu0 %v4704_v15  ;;  %v4718_v53 = vld [vmem:[#allocation8 + $0x1d0] ss:$52 sps:$4 sm:$0xff]  }
 0x287   :  { %4041 = vmatprep.subr.bf16.mxu1 %v4705_v16 }
 0x288   :  { %4020 = vmatpush3.bf16.msra.mxu0 %v4706_v17 }
 0x289   :  { %4042 = vmatpush3.bf16.msra.mxu1 %v4707_v18  ;;  %4021 = vmatprep.subr.bf16.mxu0 %v4708_v19 }
 0x28a   :  { %4043 = vmatprep.subr.bf16.mxu1 %v4709_v20  ;;  %v726_v20 = vld [vmem:[#allocation10 + $0x8] sm:$0x1f] }
 0x28c   :  { %4022 = vmatpush3.bf16.msra.mxu0 %v4710_v21  ;;  %v764_v21 = vrot.slane %v726_v20, %v5028_v30 }
 0x28d   :  { %4044 = vmatpush3.bf16.msra.mxu1 %v4711_v22  ;;  %4023 = vmatprep.subr.bf16.mxu0 %v4712_v23  ;;  %v772_v22 = vrot.slane %v726_v20, %v5059_v39  ;;  %v768_v23 = vrot.slane %v726_v20, %v5033_v32 }
 0x28e   :  { %4045 = vmatprep.subr.bf16.mxu1 %v4713_v24  ;;  %v776_v24 = vrot.slane %v726_v20, %v5038_v34 }
 0x290   :  { %4024 = vmatpush3.bf16.msra.mxu0 %v4714_v25 }
 0x291   :  { %4046 = vmatpush3.bf16.msra.mxu1 %v4715_v46  ;;  %4025 = vmatprep.subr.bf16.mxu0 %v4716_v26 }
 0x292   :  { %4047 = vmatprep.subr.bf16.mxu1 %v4717_v27 }
 0x294   :  { %4026 = vmatpush3.bf16.msra.mxu0 %v4718_v53 }
 0x295   :  { %4048 = vmatpush3.bf16.msra.mxu1 %v4719_v28  ;;  %4027 = vmatprep.subr.bf16.mxu0 %v4720_v33 }
 0x296   :  { %4049 = vmatprep.subr.bf16.mxu1 %v4721_v35 }
 0x298   :  { %4028 = vmatpush3.bf16.msra.mxu0 %v4722_v36 }
 0x299   :  { %4050 = vmatpush3.bf16.msra.mxu1 %v4723_v37  ;;  %4029 = vmatprep.subr.bf16.mxu0 %v4724_v38 }
 0x29a   :  { %4051 = vmatprep.subr.bf16.mxu1 %v4725_v40 }
 0x29c   :  { %4030 = vmatpush3.bf16.msra.mxu0 %v4726_v41 }
 0x29d   :  { %4052 = vmatpush3.bf16.msra.mxu1 %v4727_v43  ;;  %4031 = vmatprep.subr.bf16.mxu0 %v4728_v44 }
 0x29e   :  { %4053 = vmatprep.subr.bf16.mxu1 %v4729_v45 }
 0x2a0   :  { %4032 = vmatpush3.bf16.msra.mxu0 %v4730_v47 }
 0x2a1   :  { %4054 = vmatpush3.bf16.msra.mxu1 %v4731_v48 }
 0x2a3   :  { %3431 = vmatmul.mubr.bf16.vlgmr.msra.gmra.mrb[16].mxu0 %v5048_v49  ;;  %v760_v49 = vrot.slane %v5082_v51, %v759_v55 }
 0x2a4   :  { %3471 = vmatmul.mubr.bf16.vlgmr.msra.gmra.mrb[16].mxu1 %v5064_v62 }
 0x2d6   :  { %v3145_v31 = vpop.f32.mrb[8].mxu0 }
 0x2d7   :  { %v4081_v62 = vadd.f32 %v3145_v31, %v748_v56  ;;  %v3227_v59 = vpop.f32.mrb[8].mxu1  ;;  %v3147_v60 = vpop.f32.mrb[9].mxu0  ;;  %v780_v31 = vrot.slane %v726_v20, %v747_v50 }
 0x2d8   :  { %v4083_v61 = vadd.f32 %v3227_v59, %v756_v57  ;;  %v4082_v42 = vadd.f32 %v3147_v60, %v752_v58  ;;  %v3229_v63 = vpop.f32.mrb[9].mxu1  ;;  %v3149_v0 = vpop.f32.mrb[10].mxu0 }
 0x2d9   :  { %v4008_v1 = vmul.f32 -1.442695, %v4081_v62  ;;  %v4084_v2 = vadd.f32 %v3229_v63, %v760_v49  ;;  %v3231_v3 = vpop.f32.mrb[10].mxu1  ;;  %v3150_v4 = vpop.f32.mrb[11].mxu0 }
 0x2da   :  { %v4010_v5 = vmul.f32 -1.442695, %v4083_v61  ;;  %v4009_v6 = vmul.f32 -1.442695, %v4082_v42  ;;  %v3232_v7 = vpop.f32.mrb[11].mxu1 }
 0x2db   :  { %4748 = vpow2.f32 %v4008_v1  ;;  %v4011_v8 = vmul.f32 -1.442695, %v4084_v2 }
 0x2dc   :  { %4750 = vpow2.f32 %v4010_v5 }
 0x2dd   :  { %4752 = vpow2.f32 %v4009_v6 }
 0x2de   :  { %4754 = vpow2.f32 %v4011_v8 }
 0x2e5   :  { %v4749_v51 = vpop.eup %4748 }
 0x2e6   :  { %v4751_v9 = vpop.eup %4750  ;;  %v3521_v10 = vadd.f32 1.0, %v4749_v51 }
 0x2e7   :  { %v4753_v11 = vpop.eup %4752  ;;  %v3523_v12 = vadd.f32 1.0, %v4751_v9 }
 0x2e8   :  { %v4755_v13 = vpop.eup %4754  ;;  %4756 = vrcp.f32 %v3521_v10  ;;  %v3522_v14 = vadd.f32 1.0, %v4753_v11 }
 0x2e9   :  { %4758 = vrcp.f32 %v3523_v12  ;;  %v3524_v15 = vadd.f32 1.0, %v4755_v13 }
 0x2ea   :  { %4760 = vrcp.f32 %v3522_v14 }
 0x2eb   :  { %4762 = vrcp.f32 %v3524_v15 }
 0x2f2   :  { %v4757_v16 = vpop.eup %4756 }
 0x2f3   :  { %v4759_v17 = vpop.eup %4758  ;;  %3560 = vst [vmem:[#allocation11 + $0x20] sm:$0xff] %v4757_v16 }
 0x2f4   :  { %v4761_v18 = vpop.eup %4760  ;;  %3562 = vst [vmem:[#allocation11 + $0x30] sm:$0xff] %v4759_v17 }
 0x2f5   :  { %v4763_v19 = vpop.eup %4762  ;;  %3561 = vst [vmem:[#allocation11 + $0x28] sm:$0xff] %v4761_v18 }
 0x2f6   :  { %3563 = vst [vmem:[#allocation11 + $0x38] sm:$0xff] %v4763_v19 }
 0x356   :  { %v3309_v25 = vpop.f32.mrb[12].mxu0 }
 0x357   :  { %v4085_v46 = vadd.f32 %v3309_v25, %v764_v21  ;;  %v3391_v26 = vpop.f32.mrb[12].mxu1  ;;  %v3311_v27 = vpop.f32.mrb[13].mxu0 }
 0x358   :  { %v4087_v53 = vadd.f32 %v3391_v26, %v772_v22  ;;  %v4086_v28 = vadd.f32 %v3311_v27, %v768_v23  ;;  %v3393_v33 = vpop.f32.mrb[13].mxu1  ;;  %v3313_v35 = vpop.f32.mrb[14].mxu0 }
 0x359   :  { %v4012_v36 = vmul.f32 -1.442695, %v4085_v46  ;;  %v4088_v37 = vadd.f32 %v3393_v33, %v776_v24  ;;  %v3395_v38 = vpop.f32.mrb[14].mxu1  ;;  %v3314_v40 = vpop.f32.mrb[15].mxu0 }
 0x35a   :  { %v4014_v41 = vmul.f32 -1.442695, %v4087_v53  ;;  %v4013_v30 = vmul.f32 -1.442695, %v4086_v28  ;;  %v3396_v43 = vpop.f32.mrb[15].mxu1 }
 0x35b   :  { %4764 = vpow2.f32 %v4012_v36  ;;  %v4015_v39 = vmul.f32 -1.442695, %v4088_v37 }
 0x35c   :  { %4766 = vpow2.f32 %v4014_v41 }
 0x35d   :  { %4768 = vpow2.f32 %v4013_v30 }
 0x35e   :  { %4770 = vpow2.f32 %v4015_v39 }
 0x365   :  { %v4765_v32 = vpop.eup %4764 }
 0x366   :  { %v4767_v34 = vpop.eup %4766  ;;  %v3525_v44 = vadd.f32 1.0, %v4765_v32 }
 0x367   :  { %v4769_v45 = vpop.eup %4768  ;;  %v3527_v47 = vadd.f32 1.0, %v4767_v34 }
 0x368   :  { %v4771_v48 = vpop.eup %4770  ;;  %4772 = vrcp.f32 %v3525_v44  ;;  %v3526_v52 = vadd.f32 1.0, %v4769_v45 }
 0x369   :  { %4774 = vrcp.f32 %v3527_v47  ;;  %v3528_v54 = vadd.f32 1.0, %v4771_v48 }
 0x36a   :  { %4776 = vrcp.f32 %v3526_v52 }
 0x36b   :  { %4778 = vrcp.f32 %v3528_v54 }
 0x372   :  { %v4773_v55 = vpop.eup %4772 }
 0x373   :  { %v4775_v56 = vpop.eup %4774  ;;  %3564 = vst [vmem:[#allocation11 + $0x40] sm:$0xff] %v4773_v55 }
 0x374   :  { %v4777_v57 = vpop.eup %4776  ;;  %3566 = vst [vmem:[#allocation11 + $0x50] sm:$0xff] %v4775_v56 }
 0x375   :  { %v4779_v58 = vpop.eup %4778  ;;  %3565 = vst [vmem:[#allocation11 + $0x48] sm:$0xff] %v4777_v57 }
 0x376   :  { %3567 = vst [vmem:[#allocation11 + $0x58] sm:$0xff] %v4779_v58  ;;  %v4033_v49 = vpop.f32.mrb[16].mxu0 }
 0x377   :  { %v4055_v62 = vpop.f32.mrb[16].mxu1  ;;  %v4034_v59 = vpop.f32.mrb[17].mxu0 }
 0x378   :  { %v4035_v60 = vadd.f32 %v4034_v59, %v4033_v49  ;;  %v4056_v61 = vpop.f32.mrb[17].mxu1  ;;  %v4036_v42 = vpop.f32.mrb[18].mxu0 }
 0x379   :  { %v4057_v63 = vadd.f32 %v4056_v61, %v4055_v62  ;;  %v4058_v0 = vpop.f32.mrb[18].mxu1  ;;  %v4037_v1 = vpop.f32.mrb[19].mxu0 }
 0x37a   :  { %v3433_v2 = vadd.f32 %v4035_v60, %v780_v31  ;;  %v4059_v3 = vpop.f32.mrb[19].mxu1 }
 0x37c   :  { %v3473_v4 = vadd.f32 %v4057_v63, %v3433_v2 }
 0x37e   :  { %v4016_v5 = vmul.f32 -1.442695, %v3473_v4 }
 0x380   :  { %4780 = vpow2.f32 %v4016_v5 }
 0x38a   :  { %v4781_v6 = vpop.eup %4780 }
 0x38b   :  { %v3529_v7 = vadd.f32 1.0, %v4781_v6 }
 0x38d   :  { %4782 = vrcp.f32 %v3529_v7 }
 0x397   :  { %v4783_v29 = vpop.eup %4782 }
 0x398   :  { %3568 = vst [vmem:[#allocation11 + $0x60] sm:$0xff] %v4783_v29 }
 0x399   :  { %4905 = shalt.err (!%p4902_p2)
}
 0x39a   :  { %s4906_s6 = scalar_lea.hbm %s5131_s5, 1664 }
 0x39b   :  { %p4907_p3 = scmp.ne.s32.totalorder %s5131_s5, %s4906_s6  ;;  %p4910_p4 = scmp.lt.u32.totalorder %s4906_s6, %s5131_s5 }
 0x39d   :  { %p4912_p5 = pnand %p4910_p4, %p4907_p3 }
 0x39f   :  { %4915 = shalt.err (!%p4912_p5)
}
 0x3a0   :  { %3578 = dma.vmem_to_hbm [thread:$0]  %s3576_s28, 1664, %s5131_s5, [#allocation4]  }
 0x3a1   :  { %4922 = dma.done.wait [#allocation4], 1664  }
 0x3a2   :  { %4923 = vsyncadd [#allocation4], 4294965632 }
 0x3a3   :  { %3582 = vsyncpa [#allocation3], 1 }
 0x3a4   :  { %3583 = vsyncpa [#allocation6], 1 }
 0x3a5   :  { %3584 = vsyncpa [#allocation9], 1 }
 0x3a6   :  { %3585 = vsyncpa [#allocation4], 1 }

</bundles_post_ra>
